<compile_context>
chip_gen: v7x
topology: tpu7x:2x2x1
jax: 0.10.0
libtpu: 0.0.40
codegen_flags: <defaults>
</compile_context>

<pallas_src>
import functools

import jax
import jax.numpy as jnp
from jax.experimental import pallas as pl
from jax.experimental.pallas import tpu as pltpu

VMEM_SPEC = pl.BlockSpec(memory_space=pltpu.MemorySpace.VMEM)
LANE = 128


def _gelu_tanh(x):
    # TODO(synk): tanh-form GELU (EUP tanh) stands in for PyTorch's exact-erf nn.GELU
    # (~1e-3 absolute deviation); keeps the activation off the VALU slot.
    c = 0.7978845608028654  # sqrt(2/pi)
    return 0.5 * x * (1.0 + jnp.tanh(c * (x + 0.044715 * x * x * x)))


def _fused_clip_kernel(ids_ref,                                   # SMEM (B*S,) int32 (scalar prefetch)
                       img_ref,                                   # VMEM (B, C, H*W) f32
                       emb_hbm,                                   # HBM  (V, D) f32
                       sel_ref, den_ref,                          # VMEM (B, B*S), (B, 1)
                       w1_ref, b1_ref, w2_ref, b2_ref,            # fused head weights / per-row biases
                       g_ref, beta_ref, lmask_ref,                # per-row LN params + lane validity mask
                       out_ref,                                   # VMEM (2B, 128) f32  (lane-dense)
                       tok_ref, feat_ref, sems,                   # scratch
                       *, proj_dim):
    n_tok, e_txt = tok_ref.shape
    b, e_img, hw = img_ref.shape

    # 1) Text token embedding gather: one small DMA per token from the HBM-resident table.
    copies = []
    for t in range(n_tok):
        cp = pltpu.make_async_copy(emb_hbm.at[pl.ds(ids_ref[t], 1)],
                                   tok_ref.at[pl.ds(t, 1)],
                                   sems.at[t])
        cp.start()
        copies.append(cp)

    # 2) Image global average pool (overlaps with the gather DMAs): sum * 1/(H*W).
    img_feat = jnp.sum(img_ref[...], axis=-1) * (1.0 / hw)          # (B, e_img)

    for cp in copies:
        cp.wait()

    # 3) Attention-mask mean pool as a single selector matmul on the MXU.
    txt_sum = jnp.dot(sel_ref[...], tok_ref[...],
                      preferred_element_type=jnp.float32)           # (B, e_txt)
    txt_feat = txt_sum * pl.reciprocal(den_ref[...], approx=True)   # masked mean

    # 4) Stack both modalities block-structured in a VMEM scratch (no HBM round trip).
    feat_ref[...] = jnp.zeros_like(feat_ref)
    feat_ref[0:b, 0:e_img] = img_feat
    feat_ref[b:2 * b, e_img:e_img + e_txt] = txt_feat
    feat = feat_ref[...]                                            # (2B, e_img + e_txt)

    # 5) Both projection heads via block-diagonal weights: one matmul per layer.
    projected = jnp.dot(feat, w1_ref[...],
                        preferred_element_type=jnp.float32) + b1_ref[...]
    h = _gelu_tanh(projected)
    h = jnp.dot(h, w2_ref[...],
                preferred_element_type=jnp.float32) + b2_ref[...]
    h = h + projected                        # nn.Dropout == identity in eval forward

    # 6) Per-head LayerNorm over the real proj_dim lanes (padding lanes are exactly 0).
    inv_p = 1.0 / proj_dim
    mean = jnp.sum(h, axis=-1, keepdims=True) * inv_p
    centered = (h - mean) * lmask_ref[...]
    var = jnp.sum(centered * centered, axis=-1, keepdims=True) * inv_p
    out_ref[...] = centered * jax.lax.rsqrt(var + 1e-5) * g_ref[...] + beta_ref[...]


def init_projection_head(key, embedding_dim, projection_dim):
    k1, k2, k3, k4 = jax.random.split(key, 4)
    return {
        "w1": 0.02 * jax.random.normal(k1, (embedding_dim, projection_dim), jnp.float32),
        "b1": 0.01 * jax.random.normal(k3, (1, projection_dim), jnp.float32),
        "w2": 0.02 * jax.random.normal(k2, (projection_dim, projection_dim), jnp.float32),
        "b2": 0.01 * jax.random.normal(k4, (1, projection_dim), jnp.float32),
        "gamma": jnp.ones((1, projection_dim), jnp.float32),
        "beta": jnp.zeros((1, projection_dim), jnp.float32),
    }


def restmg_forward(batch, params):
    """RestMGModel.forward: returns (image_embeddings, text_embeddings)."""
    image = batch["image"]
    input_ids = batch["input_ids"]
    attention_mask = batch["attention_mask"]
    emb_table = params["text_emb_table"]
    p_img = params["image_projection"]
    p_txt = params["text_projection"]

    B, C, H, W = image.shape
    S = input_ids.shape[1]
    V, d_txt = emb_table.shape
    e_img = p_img["w1"].shape[0]
    e_txt = p_txt["w1"].shape[0]
    P = p_img["w1"].shape[1]
    Ppad = ((2 * P + LANE - 1) // LANE) * LANE          # lane-dense output width

    image_flat = image.reshape(B, C, H * W)
    ids_flat = input_ids.reshape(-1).astype(jnp.int32)

    # Block-diagonal selector for the per-batch masked mean pool (single MXU matmul).
    mask_f = attention_mask.astype(jnp.float32)                           # (B, S)
    sel = (jnp.eye(B, dtype=jnp.float32)[:, :, None] * mask_f[None, :, :]).reshape(B, B * S)
    den = jnp.maximum(jnp.sum(mask_f, axis=1, keepdims=True), 1.0)        # (B, 1), NaN-safe

    # Fused, lane-padded block-diagonal projection-head parameters.
    w1 = jnp.zeros((e_img + e_txt, Ppad), jnp.float32)
    w1 = w1.at[:e_img, 0:P].set(p_img["w1"]).at[e_img:, P:2 * P].set(p_txt["w1"])
    w2 = jnp.zeros((Ppad, Ppad), jnp.float32)
    w2 = w2.at[0:P, 0:P].set(p_img["w2"]).at[P:2 * P, P:2 * P].set(p_txt["w2"])

    def rowify(a_img, a_txt):
        r_img = jnp.zeros((Ppad,), jnp.float32).at[0:P].set(a_img.reshape(-1))
        r_txt = jnp.zeros((Ppad,), jnp.float32).at[P:2 * P].set(a_txt.reshape(-1))
        return jnp.concatenate([jnp.broadcast_to(r_img, (B, Ppad)),
                                jnp.broadcast_to(r_txt, (B, Ppad))], axis=0)   # (2B, Ppad)

    b1 = rowify(p_img["b1"], p_txt["b1"])
    b2 = rowify(p_img["b2"], p_txt["b2"])
    gamma = rowify(p_img["gamma"], p_txt["gamma"])
    beta = rowify(p_img["beta"], p_txt["beta"])
    ones_p = jnp.ones((P,), jnp.float32)
    lane_mask = rowify(ones_p, ones_p)

    kernel = functools.partial(_fused_clip_kernel, proj_dim=P)

    out = pl.pallas_call(
        kernel,
        out_shape=jax.ShapeDtypeStruct((2 * B, Ppad), jnp.float32),
        grid_spec=pltpu.PrefetchScalarGridSpec(
            num_scalar_prefetch=1,
            grid=(1,),
            in_specs=[
                VMEM_SPEC,                              # image feature map (flattened)
                pl.BlockSpec(memory_space=pl.ANY),      # embedding table stays in HBM
                VMEM_SPEC, VMEM_SPEC,                   # selector, denominator
                VMEM_SPEC, VMEM_SPEC,                   # w1, b1
                VMEM_SPEC, VMEM_SPEC,                   # w2, b2
                VMEM_SPEC, VMEM_SPEC, VMEM_SPEC,        # gamma, beta, lane mask
            ],
            out_specs=VMEM_SPEC,
            scratch_shapes=[
                pltpu.VMEM((B * S, d_txt), jnp.float32),            # gathered token embeddings
                pltpu.VMEM((2 * B, e_img + e_txt), jnp.float32),    # stacked feature slab
                pltpu.SemaphoreType.DMA((B * S,)),                  # gather DMA semaphores
            ],
        ),
        compiler_params=pltpu.CompilerParams(dimension_semantics=("arbitrary",)),
    )(ids_flat, image_flat, emb_table, sel, den, w1, b1, w2, b2, gamma, beta, lane_mask)

    image_embeddings = out[:B, 0:P]
    text_embeddings = out[B:, P:2 * P]
    return image_embeddings, text_embeddings


if __name__ == "__main__":
    B = 2
    IMAGE_EMBEDDING = 64   # CFG.image_embedding == backbone feature channels
    TEXT_EMBEDDING = 64    # CFG.text_embedding
    PROJECTION_DIM = 32    # CFG.projection_dim
    H = W = 16
    SEQ = 8
    VOCAB = 128

    key = jax.random.PRNGKey(0)
    k_img, k_ids, k_emb, k_pi, k_pt = jax.random.split(key, 5)

    batch = {
        "image": jax.random.normal(k_img, (B, IMAGE_EMBEDDING, H, W), jnp.float32),
        "input_ids": jax.random.randint(k_ids, (B, SEQ), 0, VOCAB, dtype=jnp.int32),
        "attention_mask": jnp.array([[1, 1, 1, 1, 1, 0, 0, 0],
                                     [1, 1, 1, 1, 1, 1, 1, 1]], dtype=jnp.int32),
    }

    params = {
        "text_emb_table": 0.02 * jax.random.normal(k_emb, (VOCAB, TEXT_EMBEDDING), jnp.float32),
        "image_projection": init_projection_head(k_pi, IMAGE_EMBEDDING, PROJECTION_DIM),
        "text_projection": init_projection_head(k_pt, TEXT_EMBEDDING, PROJECTION_DIM),
    }

    image_embeddings, text_embeddings = restmg_forward(batch, params)
    jax.block_until_ready((image_embeddings, text_embeddings))

    assert image_embeddings.shape == (B, PROJECTION_DIM)
    assert text_embeddings.shape == (B, PROJECTION_DIM)
    assert bool(jnp.all(jnp.isfinite(image_embeddings)))
    assert bool(jnp.all(jnp.isfinite(text_embeddings)))
    print("KERNEL_OK")
</pallas_src>

<mosaic_0001>
module attributes {stable_mosaic.version = 11 : i64} {
  func.func @_fused_clip_kernel(%arg0: i32, %arg1: memref<16xi32, #tpu.memory_space<smem>>, %arg2: memref<2x64x256xf32, #tpu.memory_space<vmem>>, %arg3: memref<128x64xf32, #tpu.memory_space<any>>, %arg4: memref<2x16xf32, #tpu.memory_space<vmem>>, %arg5: memref<2x1xf32, #tpu.memory_space<vmem>>, %arg6: memref<128x128xf32, #tpu.memory_space<vmem>>, %arg7: memref<4x128xf32, #tpu.memory_space<vmem>>, %arg8: memref<128x128xf32, #tpu.memory_space<vmem>>, %arg9: memref<4x128xf32, #tpu.memory_space<vmem>>, %arg10: memref<4x128xf32, #tpu.memory_space<vmem>>, %arg11: memref<4x128xf32, #tpu.memory_space<vmem>>, %arg12: memref<4x128xf32, #tpu.memory_space<vmem>>, %arg13: memref<4x128xf32, #tpu.memory_space<vmem>>, %arg14: memref<16x64xf32, #tpu.memory_space<vmem>>, %arg15: memref<4x128xf32, #tpu.memory_space<vmem>>, %arg16: memref<16x!tpu.dma_semaphore, #tpu.memory_space<semaphore_mem>>) attributes {dimension_semantics = [#tpu.dimension_semantics<arbitrary>], iteration_bounds = array<i64: 1>, scalar_prefetch = 1 : i64, scratch_operands = 3 : i64, tpu.core_type = #tpu.core_type<tc>, window_params = [{pipeline_mode = #tpu.pipeline_mode<synchronous>, transform_indices = @transform_0, window_bounds = array<i64: 2, 64, 256>}, {}, {pipeline_mode = #tpu.pipeline_mode<synchronous>, transform_indices = @transform_2, window_bounds = array<i64: 2, 16>}, {pipeline_mode = #tpu.pipeline_mode<synchronous>, transform_indices = @transform_3, window_bounds = array<i64: 2, 1>}, {pipeline_mode = #tpu.pipeline_mode<synchronous>, transform_indices = @transform_4, window_bounds = array<i64: 128, 128>}, {pipeline_mode = #tpu.pipeline_mode<synchronous>, transform_indices = @transform_5, window_bounds = array<i64: 4, 128>}, {pipeline_mode = #tpu.pipeline_mode<synchronous>, transform_indices = @transform_6, window_bounds = array<i64: 128, 128>}, {pipeline_mode = #tpu.pipeline_mode<synchronous>, transform_indices = @transform_7, window_bounds = array<i64: 4, 128>}, {pipeline_mode = #tpu.pipeline_mode<synchronous>, transform_indices = @transform_8, window_bounds = array<i64: 4, 128>}, {pipeline_mode = #tpu.pipeline_mode<synchronous>, transform_indices = @transform_9, window_bounds = array<i64: 4, 128>}, {pipeline_mode = #tpu.pipeline_mode<synchronous>, transform_indices = @transform_10, window_bounds = array<i64: 4, 128>}, {pipeline_mode = #tpu.pipeline_mode<synchronous>, transform_indices = @transform_11, window_bounds = array<i64: 4, 128>}]} {
    %c0 = arith.constant 0 : index
    %0 = memref.load %arg1[%c0] : memref<16xi32, #tpu.memory_space<smem>>
    %c0_i32 = arith.constant 0 : i32
    %c0_i32_0 = arith.constant 0 : i32
    %1 = tpu.memref_slice %arg3[%0, %c0_i32_0] : memref<128x64xf32, #tpu.memory_space<any>> -> memref<1x64xf32, #tpu.memory_space<any>>
    %c0_i32_1 = arith.constant 0 : i32
    %c0_i32_2 = arith.constant 0 : i32
    %2 = tpu.memref_slice %arg14[%c0_i32_1, %c0_i32_2] : memref<16x64xf32, #tpu.memory_space<vmem>> -> memref<1x64xf32, #tpu.memory_space<vmem>>
    %3 = tpu.memref_slice %arg16[%c0_i32] : memref<16x!tpu.dma_semaphore, #tpu.memory_space<semaphore_mem>> -> memref<1x!tpu.dma_semaphore, #tpu.memory_space<semaphore_mem>>
    %4 = tpu.memref_squeeze %3 : memref<1x!tpu.dma_semaphore, #tpu.memory_space<semaphore_mem>> -> memref<!tpu.dma_semaphore, #tpu.memory_space<semaphore_mem>>
    tpu.enqueue_dma source(%1 : memref<1x64xf32, #tpu.memory_space<any>>) target(%2 : memref<1x64xf32, #tpu.memory_space<vmem>>) target_semaphore(%4 : memref<!tpu.dma_semaphore, #tpu.memory_space<semaphore_mem>>)
    %c1 = arith.constant 1 : index
    %5 = memref.load %arg1[%c1] : memref<16xi32, #tpu.memory_space<smem>>
    %c1_i32 = arith.constant 1 : i32
    %c0_i32_3 = arith.constant 0 : i32
    %6 = tpu.memref_slice %arg3[%5, %c0_i32_3] : memref<128x64xf32, #tpu.memory_space<any>> -> memref<1x64xf32, #tpu.memory_space<any>>
    %c1_i32_4 = arith.constant 1 : i32
    %c0_i32_5 = arith.constant 0 : i32
    %7 = tpu.memref_slice %arg14[%c1_i32_4, %c0_i32_5] : memref<16x64xf32, #tpu.memory_space<vmem>> -> memref<1x64xf32, #tpu.memory_space<vmem>>
    %8 = tpu.memref_slice %arg16[%c1_i32] : memref<16x!tpu.dma_semaphore, #tpu.memory_space<semaphore_mem>> -> memref<1x!tpu.dma_semaphore, #tpu.memory_space<semaphore_mem>>
    %9 = tpu.memref_squeeze %8 : memref<1x!tpu.dma_semaphore, #tpu.memory_space<semaphore_mem>> -> memref<!tpu.dma_semaphore, #tpu.memory_space<semaphore_mem>>
    tpu.enqueue_dma source(%6 : memref<1x64xf32, #tpu.memory_space<any>>) target(%7 : memref<1x64xf32, #tpu.memory_space<vmem>>) target_semaphore(%9 : memref<!tpu.dma_semaphore, #tpu.memory_space<semaphore_mem>>)
    %c2 = arith.constant 2 : index
    %10 = memref.load %arg1[%c2] : memref<16xi32, #tpu.memory_space<smem>>
    %c2_i32 = arith.constant 2 : i32
    %c0_i32_6 = arith.constant 0 : i32
    %11 = tpu.memref_slice %arg3[%10, %c0_i32_6] : memref<128x64xf32, #tpu.memory_space<any>> -> memref<1x64xf32, #tpu.memory_space<any>>
    %c2_i32_7 = arith.constant 2 : i32
    %c0_i32_8 = arith.constant 0 : i32
    %12 = tpu.memref_slice %arg14[%c2_i32_7, %c0_i32_8] : memref<16x64xf32, #tpu.memory_space<vmem>> -> memref<1x64xf32, #tpu.memory_space<vmem>>
    %13 = tpu.memref_slice %arg16[%c2_i32] : memref<16x!tpu.dma_semaphore, #tpu.memory_space<semaphore_mem>> -> memref<1x!tpu.dma_semaphore, #tpu.memory_space<semaphore_mem>>
    %14 = tpu.memref_squeeze %13 : memref<1x!tpu.dma_semaphore, #tpu.memory_space<semaphore_mem>> -> memref<!tpu.dma_semaphore, #tpu.memory_space<semaphore_mem>>
    tpu.enqueue_dma source(%11 : memref<1x64xf32, #tpu.memory_space<any>>) target(%12 : memref<1x64xf32, #tpu.memory_space<vmem>>) target_semaphore(%14 : memref<!tpu.dma_semaphore, #tpu.memory_space<semaphore_mem>>)
    %c3 = arith.constant 3 : index
    %15 = memref.load %arg1[%c3] : memref<16xi32, #tpu.memory_space<smem>>
    %c3_i32 = arith.constant 3 : i32
    %c0_i32_9 = arith.constant 0 : i32
    %16 = tpu.memref_slice %arg3[%15, %c0_i32_9] : memref<128x64xf32, #tpu.memory_space<any>> -> memref<1x64xf32, #tpu.memory_space<any>>
    %c3_i32_10 = arith.constant 3 : i32
    %c0_i32_11 = arith.constant 0 : i32
    %17 = tpu.memref_slice %arg14[%c3_i32_10, %c0_i32_11] : memref<16x64xf32, #tpu.memory_space<vmem>> -> memref<1x64xf32, #tpu.memory_space<vmem>>
    %18 = tpu.memref_slice %arg16[%c3_i32] : memref<16x!tpu.dma_semaphore, #tpu.memory_space<semaphore_mem>> -> memref<1x!tpu.dma_semaphore, #tpu.memory_space<semaphore_mem>>
    %19 = tpu.memref_squeeze %18 : memref<1x!tpu.dma_semaphore, #tpu.memory_space<semaphore_mem>> -> memref<!tpu.dma_semaphore, #tpu.memory_space<semaphore_mem>>
    tpu.enqueue_dma source(%16 : memref<1x64xf32, #tpu.memory_space<any>>) target(%17 : memref<1x64xf32, #tpu.memory_space<vmem>>) target_semaphore(%19 : memref<!tpu.dma_semaphore, #tpu.memory_space<semaphore_mem>>)
    %c4 = arith.constant 4 : index
    %20 = memref.load %arg1[%c4] : memref<16xi32, #tpu.memory_space<smem>>
    %c4_i32 = arith.constant 4 : i32
    %c0_i32_12 = arith.constant 0 : i32
    %21 = tpu.memref_slice %arg3[%20, %c0_i32_12] : memref<128x64xf32, #tpu.memory_space<any>> -> memref<1x64xf32, #tpu.memory_space<any>>
    %c4_i32_13 = arith.constant 4 : i32
    %c0_i32_14 = arith.constant 0 : i32
    %22 = tpu.memref_slice %arg14[%c4_i32_13, %c0_i32_14] : memref<16x64xf32, #tpu.memory_space<vmem>> -> memref<1x64xf32, #tpu.memory_space<vmem>>
    %23 = tpu.memref_slice %arg16[%c4_i32] : memref<16x!tpu.dma_semaphore, #tpu.memory_space<semaphore_mem>> -> memref<1x!tpu.dma_semaphore, #tpu.memory_space<semaphore_mem>>
    %24 = tpu.memref_squeeze %23 : memref<1x!tpu.dma_semaphore, #tpu.memory_space<semaphore_mem>> -> memref<!tpu.dma_semaphore, #tpu.memory_space<semaphore_mem>>
    tpu.enqueue_dma source(%21 : memref<1x64xf32, #tpu.memory_space<any>>) target(%22 : memref<1x64xf32, #tpu.memory_space<vmem>>) target_semaphore(%24 : memref<!tpu.dma_semaphore, #tpu.memory_space<semaphore_mem>>)
    %c5 = arith.constant 5 : index
    %25 = memref.load %arg1[%c5] : memref<16xi32, #tpu.memory_space<smem>>
    %c5_i32 = arith.constant 5 : i32
    %c0_i32_15 = arith.constant 0 : i32
    %26 = tpu.memref_slice %arg3[%25, %c0_i32_15] : memref<128x64xf32, #tpu.memory_space<any>> -> memref<1x64xf32, #tpu.memory_space<any>>
    %c5_i32_16 = arith.constant 5 : i32
    %c0_i32_17 = arith.constant 0 : i32
    %27 = tpu.memref_slice %arg14[%c5_i32_16, %c0_i32_17] : memref<16x64xf32, #tpu.memory_space<vmem>> -> memref<1x64xf32, #tpu.memory_space<vmem>>
    %28 = tpu.memref_slice %arg16[%c5_i32] : memref<16x!tpu.dma_semaphore, #tpu.memory_space<semaphore_mem>> -> memref<1x!tpu.dma_semaphore, #tpu.memory_space<semaphore_mem>>
    %29 = tpu.memref_squeeze %28 : memref<1x!tpu.dma_semaphore, #tpu.memory_space<semaphore_mem>> -> memref<!tpu.dma_semaphore, #tpu.memory_space<semaphore_mem>>
    tpu.enqueue_dma source(%26 : memref<1x64xf32, #tpu.memory_space<any>>) target(%27 : memref<1x64xf32, #tpu.memory_space<vmem>>) target_semaphore(%29 : memref<!tpu.dma_semaphore, #tpu.memory_space<semaphore_mem>>)
    %c6 = arith.constant 6 : index
    %30 = memref.load %arg1[%c6] : memref<16xi32, #tpu.memory_space<smem>>
    %c6_i32 = arith.constant 6 : i32
    %c0_i32_18 = arith.constant 0 : i32
    %31 = tpu.memref_slice %arg3[%30, %c0_i32_18] : memref<128x64xf32, #tpu.memory_space<any>> -> memref<1x64xf32, #tpu.memory_space<any>>
    %c6_i32_19 = arith.constant 6 : i32
    %c0_i32_20 = arith.constant 0 : i32
    %32 = tpu.memref_slice %arg14[%c6_i32_19, %c0_i32_20] : memref<16x64xf32, #tpu.memory_space<vmem>> -> memref<1x64xf32, #tpu.memory_space<vmem>>
    %33 = tpu.memref_slice %arg16[%c6_i32] : memref<16x!tpu.dma_semaphore, #tpu.memory_space<semaphore_mem>> -> memref<1x!tpu.dma_semaphore, #tpu.memory_space<semaphore_mem>>
    %34 = tpu.memref_squeeze %33 : memref<1x!tpu.dma_semaphore, #tpu.memory_space<semaphore_mem>> -> memref<!tpu.dma_semaphore, #tpu.memory_space<semaphore_mem>>
    tpu.enqueue_dma source(%31 : memref<1x64xf32, #tpu.memory_space<any>>) target(%32 : memref<1x64xf32, #tpu.memory_space<vmem>>) target_semaphore(%34 : memref<!tpu.dma_semaphore, #tpu.memory_space<semaphore_mem>>)
    %c7 = arith.constant 7 : index
    %35 = memref.load %arg1[%c7] : memref<16xi32, #tpu.memory_space<smem>>
    %c7_i32 = arith.constant 7 : i32
    %c0_i32_21 = arith.constant 0 : i32
    %36 = tpu.memref_slice %arg3[%35, %c0_i32_21] : memref<128x64xf32, #tpu.memory_space<any>> -> memref<1x64xf32, #tpu.memory_space<any>>
    %c7_i32_22 = arith.constant 7 : i32
    %c0_i32_23 = arith.constant 0 : i32
    %37 = tpu.memref_slice %arg14[%c7_i32_22, %c0_i32_23] : memref<16x64xf32, #tpu.memory_space<vmem>> -> memref<1x64xf32, #tpu.memory_space<vmem>>
    %38 = tpu.memref_slice %arg16[%c7_i32] : memref<16x!tpu.dma_semaphore, #tpu.memory_space<semaphore_mem>> -> memref<1x!tpu.dma_semaphore, #tpu.memory_space<semaphore_mem>>
    %39 = tpu.memref_squeeze %38 : memref<1x!tpu.dma_semaphore, #tpu.memory_space<semaphore_mem>> -> memref<!tpu.dma_semaphore, #tpu.memory_space<semaphore_mem>>
    tpu.enqueue_dma source(%36 : memref<1x64xf32, #tpu.memory_space<any>>) target(%37 : memref<1x64xf32, #tpu.memory_space<vmem>>) target_semaphore(%39 : memref<!tpu.dma_semaphore, #tpu.memory_space<semaphore_mem>>)
    %c8 = arith.constant 8 : index
    %40 = memref.load %arg1[%c8] : memref<16xi32, #tpu.memory_space<smem>>
    %c8_i32 = arith.constant 8 : i32
    %c0_i32_24 = arith.constant 0 : i32
    %41 = tpu.memref_slice %arg3[%40, %c0_i32_24] : memref<128x64xf32, #tpu.memory_space<any>> -> memref<1x64xf32, #tpu.memory_space<any>>
    %c8_i32_25 = arith.constant 8 : i32
    %c0_i32_26 = arith.constant 0 : i32
    %42 = tpu.memref_slice %arg14[%c8_i32_25, %c0_i32_26] : memref<16x64xf32, #tpu.memory_space<vmem>> -> memref<1x64xf32, #tpu.memory_space<vmem>>
    %43 = tpu.memref_slice %arg16[%c8_i32] : memref<16x!tpu.dma_semaphore, #tpu.memory_space<semaphore_mem>> -> memref<1x!tpu.dma_semaphore, #tpu.memory_space<semaphore_mem>>
    %44 = tpu.memref_squeeze %43 : memref<1x!tpu.dma_semaphore, #tpu.memory_space<semaphore_mem>> -> memref<!tpu.dma_semaphore, #tpu.memory_space<semaphore_mem>>
    tpu.enqueue_dma source(%41 : memref<1x64xf32, #tpu.memory_space<any>>) target(%42 : memref<1x64xf32, #tpu.memory_space<vmem>>) target_semaphore(%44 : memref<!tpu.dma_semaphore, #tpu.memory_space<semaphore_mem>>)
    %c9 = arith.constant 9 : index
    %45 = memref.load %arg1[%c9] : memref<16xi32, #tpu.memory_space<smem>>
    %c9_i32 = arith.constant 9 : i32
    %c0_i32_27 = arith.constant 0 : i32
    %46 = tpu.memref_slice %arg3[%45, %c0_i32_27] : memref<128x64xf32, #tpu.memory_space<any>> -> memref<1x64xf32, #tpu.memory_space<any>>
    %c9_i32_28 = arith.constant 9 : i32
    %c0_i32_29 = arith.constant 0 : i32
    %47 = tpu.memref_slice %arg14[%c9_i32_28, %c0_i32_29] : memref<16x64xf32, #tpu.memory_space<vmem>> -> memref<1x64xf32, #tpu.memory_space<vmem>>
    %48 = tpu.memref_slice %arg16[%c9_i32] : memref<16x!tpu.dma_semaphore, #tpu.memory_space<semaphore_mem>> -> memref<1x!tpu.dma_semaphore, #tpu.memory_space<semaphore_mem>>
    %49 = tpu.memref_squeeze %48 : memref<1x!tpu.dma_semaphore, #tpu.memory_space<semaphore_mem>> -> memref<!tpu.dma_semaphore, #tpu.memory_space<semaphore_mem>>
    tpu.enqueue_dma source(%46 : memref<1x64xf32, #tpu.memory_space<any>>) target(%47 : memref<1x64xf32, #tpu.memory_space<vmem>>) target_semaphore(%49 : memref<!tpu.dma_semaphore, #tpu.memory_space<semaphore_mem>>)
    %c10 = arith.constant 10 : index
    %50 = memref.load %arg1[%c10] : memref<16xi32, #tpu.memory_space<smem>>
    %c10_i32 = arith.constant 10 : i32
    %c0_i32_30 = arith.constant 0 : i32
    %51 = tpu.memref_slice %arg3[%50, %c0_i32_30] : memref<128x64xf32, #tpu.memory_space<any>> -> memref<1x64xf32, #tpu.memory_space<any>>
    %c10_i32_31 = arith.constant 10 : i32
    %c0_i32_32 = arith.constant 0 : i32
    %52 = tpu.memref_slice %arg14[%c10_i32_31, %c0_i32_32] : memref<16x64xf32, #tpu.memory_space<vmem>> -> memref<1x64xf32, #tpu.memory_space<vmem>>
    %53 = tpu.memref_slice %arg16[%c10_i32] : memref<16x!tpu.dma_semaphore, #tpu.memory_space<semaphore_mem>> -> memref<1x!tpu.dma_semaphore, #tpu.memory_space<semaphore_mem>>
    %54 = tpu.memref_squeeze %53 : memref<1x!tpu.dma_semaphore, #tpu.memory_space<semaphore_mem>> -> memref<!tpu.dma_semaphore, #tpu.memory_space<semaphore_mem>>
    tpu.enqueue_dma source(%51 : memref<1x64xf32, #tpu.memory_space<any>>) target(%52 : memref<1x64xf32, #tpu.memory_space<vmem>>) target_semaphore(%54 : memref<!tpu.dma_semaphore, #tpu.memory_space<semaphore_mem>>)
    %c11 = arith.constant 11 : index
    %55 = memref.load %arg1[%c11] : memref<16xi32, #tpu.memory_space<smem>>
    %c11_i32 = arith.constant 11 : i32
    %c0_i32_33 = arith.constant 0 : i32
    %56 = tpu.memref_slice %arg3[%55, %c0_i32_33] : memref<128x64xf32, #tpu.memory_space<any>> -> memref<1x64xf32, #tpu.memory_space<any>>
    %c11_i32_34 = arith.constant 11 : i32
    %c0_i32_35 = arith.constant 0 : i32
    %57 = tpu.memref_slice %arg14[%c11_i32_34, %c0_i32_35] : memref<16x64xf32, #tpu.memory_space<vmem>> -> memref<1x64xf32, #tpu.memory_space<vmem>>
    %58 = tpu.memref_slice %arg16[%c11_i32] : memref<16x!tpu.dma_semaphore, #tpu.memory_space<semaphore_mem>> -> memref<1x!tpu.dma_semaphore, #tpu.memory_space<semaphore_mem>>
    %59 = tpu.memref_squeeze %58 : memref<1x!tpu.dma_semaphore, #tpu.memory_space<semaphore_mem>> -> memref<!tpu.dma_semaphore, #tpu.memory_space<semaphore_mem>>
    tpu.enqueue_dma source(%56 : memref<1x64xf32, #tpu.memory_space<any>>) target(%57 : memref<1x64xf32, #tpu.memory_space<vmem>>) target_semaphore(%59 : memref<!tpu.dma_semaphore, #tpu.memory_space<semaphore_mem>>)
    %c12 = arith.constant 12 : index
    %60 = memref.load %arg1[%c12] : memref<16xi32, #tpu.memory_space<smem>>
    %c12_i32 = arith.constant 12 : i32
    %c0_i32_36 = arith.constant 0 : i32
    %61 = tpu.memref_slice %arg3[%60, %c0_i32_36] : memref<128x64xf32, #tpu.memory_space<any>> -> memref<1x64xf32, #tpu.memory_space<any>>
    %c12_i32_37 = arith.constant 12 : i32
    %c0_i32_38 = arith.constant 0 : i32
    %62 = tpu.memref_slice %arg14[%c12_i32_37, %c0_i32_38] : memref<16x64xf32, #tpu.memory_space<vmem>> -> memref<1x64xf32, #tpu.memory_space<vmem>>
    %63 = tpu.memref_slice %arg16[%c12_i32] : memref<16x!tpu.dma_semaphore, #tpu.memory_space<semaphore_mem>> -> memref<1x!tpu.dma_semaphore, #tpu.memory_space<semaphore_mem>>
    %64 = tpu.memref_squeeze %63 : memref<1x!tpu.dma_semaphore, #tpu.memory_space<semaphore_mem>> -> memref<!tpu.dma_semaphore, #tpu.memory_space<semaphore_mem>>
    tpu.enqueue_dma source(%61 : memref<1x64xf32, #tpu.memory_space<any>>) target(%62 : memref<1x64xf32, #tpu.memory_space<vmem>>) target_semaphore(%64 : memref<!tpu.dma_semaphore, #tpu.memory_space<semaphore_mem>>)
    %c13 = arith.constant 13 : index
    %65 = memref.load %arg1[%c13] : memref<16xi32, #tpu.memory_space<smem>>
    %c13_i32 = arith.constant 13 : i32
    %c0_i32_39 = arith.constant 0 : i32
    %66 = tpu.memref_slice %arg3[%65, %c0_i32_39] : memref<128x64xf32, #tpu.memory_space<any>> -> memref<1x64xf32, #tpu.memory_space<any>>
    %c13_i32_40 = arith.constant 13 : i32
    %c0_i32_41 = arith.constant 0 : i32
    %67 = tpu.memref_slice %arg14[%c13_i32_40, %c0_i32_41] : memref<16x64xf32, #tpu.memory_space<vmem>> -> memref<1x64xf32, #tpu.memory_space<vmem>>
    %68 = tpu.memref_slice %arg16[%c13_i32] : memref<16x!tpu.dma_semaphore, #tpu.memory_space<semaphore_mem>> -> memref<1x!tpu.dma_semaphore, #tpu.memory_space<semaphore_mem>>
    %69 = tpu.memref_squeeze %68 : memref<1x!tpu.dma_semaphore, #tpu.memory_space<semaphore_mem>> -> memref<!tpu.dma_semaphore, #tpu.memory_space<semaphore_mem>>
    tpu.enqueue_dma source(%66 : memref<1x64xf32, #tpu.memory_space<any>>) target(%67 : memref<1x64xf32, #tpu.memory_space<vmem>>) target_semaphore(%69 : memref<!tpu.dma_semaphore, #tpu.memory_space<semaphore_mem>>)
    %c14 = arith.constant 14 : index
    %70 = memref.load %arg1[%c14] : memref<16xi32, #tpu.memory_space<smem>>
    %c14_i32 = arith.constant 14 : i32
    %c0_i32_42 = arith.constant 0 : i32
    %71 = tpu.memref_slice %arg3[%70, %c0_i32_42] : memref<128x64xf32, #tpu.memory_space<any>> -> memref<1x64xf32, #tpu.memory_space<any>>
    %c14_i32_43 = arith.constant 14 : i32
    %c0_i32_44 = arith.constant 0 : i32
    %72 = tpu.memref_slice %arg14[%c14_i32_43, %c0_i32_44] : memref<16x64xf32, #tpu.memory_space<vmem>> -> memref<1x64xf32, #tpu.memory_space<vmem>>
    %73 = tpu.memref_slice %arg16[%c14_i32] : memref<16x!tpu.dma_semaphore, #tpu.memory_space<semaphore_mem>> -> memref<1x!tpu.dma_semaphore, #tpu.memory_space<semaphore_mem>>
    %74 = tpu.memref_squeeze %73 : memref<1x!tpu.dma_semaphore, #tpu.memory_space<semaphore_mem>> -> memref<!tpu.dma_semaphore, #tpu.memory_space<semaphore_mem>>
    tpu.enqueue_dma source(%71 : memref<1x64xf32, #tpu.memory_space<any>>) target(%72 : memref<1x64xf32, #tpu.memory_space<vmem>>) target_semaphore(%74 : memref<!tpu.dma_semaphore, #tpu.memory_space<semaphore_mem>>)
    %c15 = arith.constant 15 : index
    %75 = memref.load %arg1[%c15] : memref<16xi32, #tpu.memory_space<smem>>
    %c15_i32 = arith.constant 15 : i32
    %c0_i32_45 = arith.constant 0 : i32
    %76 = tpu.memref_slice %arg3[%75, %c0_i32_45] : memref<128x64xf32, #tpu.memory_space<any>> -> memref<1x64xf32, #tpu.memory_space<any>>
    %c15_i32_46 = arith.constant 15 : i32
    %c0_i32_47 = arith.constant 0 : i32
    %77 = tpu.memref_slice %arg14[%c15_i32_46, %c0_i32_47] : memref<16x64xf32, #tpu.memory_space<vmem>> -> memref<1x64xf32, #tpu.memory_space<vmem>>
    %78 = tpu.memref_slice %arg16[%c15_i32] : memref<16x!tpu.dma_semaphore, #tpu.memory_space<semaphore_mem>> -> memref<1x!tpu.dma_semaphore, #tpu.memory_space<semaphore_mem>>
    %79 = tpu.memref_squeeze %78 : memref<1x!tpu.dma_semaphore, #tpu.memory_space<semaphore_mem>> -> memref<!tpu.dma_semaphore, #tpu.memory_space<semaphore_mem>>
    tpu.enqueue_dma source(%76 : memref<1x64xf32, #tpu.memory_space<any>>) target(%77 : memref<1x64xf32, #tpu.memory_space<vmem>>) target_semaphore(%79 : memref<!tpu.dma_semaphore, #tpu.memory_space<semaphore_mem>>)
    %c0_48 = arith.constant 0 : index
    %c0_49 = arith.constant 0 : index
    %c0_50 = arith.constant 0 : index
    %80 = vector.load %arg2[%c0_48, %c0_49, %c0_50] : memref<2x64x256xf32, #tpu.memory_space<vmem>>, vector<2x64x256xf32>
    %cst = arith.constant dense<0.000000e+00> : vector<2x64xf32>
    %81 = vector.multi_reduction <add>, %80, %cst [2] : vector<2x64x256xf32> to vector<2x64xf32>
    %cst_51 = arith.constant 3.906250e-03 : f32
    %82 = vector.broadcast %cst_51 : f32 to vector<2x64xf32>
    %83 = arith.mulf %81, %82 : vector<2x64xf32>
    %c0_i32_52 = arith.constant 0 : i32
    %c0_i32_53 = arith.constant 0 : i32
    %84 = tpu.memref_slice %arg3[%0, %c0_i32_53] : memref<128x64xf32, #tpu.memory_space<any>> -> memref<1x64xf32, #tpu.memory_space<any>>
    %c0_i32_54 = arith.constant 0 : i32
    %c0_i32_55 = arith.constant 0 : i32
    %85 = tpu.memref_slice %arg14[%c0_i32_54, %c0_i32_55] : memref<16x64xf32, #tpu.memory_space<vmem>> -> memref<1x64xf32, #tpu.memory_space<vmem>>
    %86 = tpu.memref_slice %arg16[%c0_i32_52] : memref<16x!tpu.dma_semaphore, #tpu.memory_space<semaphore_mem>> -> memref<1x!tpu.dma_semaphore, #tpu.memory_space<semaphore_mem>>
    %87 = tpu.memref_squeeze %86 : memref<1x!tpu.dma_semaphore, #tpu.memory_space<semaphore_mem>> -> memref<!tpu.dma_semaphore, #tpu.memory_space<semaphore_mem>>
    tpu.wait_dma2 semaphore(%87 : memref<!tpu.dma_semaphore, #tpu.memory_space<semaphore_mem>>) src(%84 : memref<1x64xf32, #tpu.memory_space<any>>) dst(%85 : memref<1x64xf32, #tpu.memory_space<vmem>>)
    %c1_i32_56 = arith.constant 1 : i32
    %c0_i32_57 = arith.constant 0 : i32
    %88 = tpu.memref_slice %arg3[%5, %c0_i32_57] : memref<128x64xf32, #tpu.memory_space<any>> -> memref<1x64xf32, #tpu.memory_space<any>>
    %c1_i32_58 = arith.constant 1 : i32
    %c0_i32_59 = arith.constant 0 : i32
    %89 = tpu.memref_slice %arg14[%c1_i32_58, %c0_i32_59] : memref<16x64xf32, #tpu.memory_space<vmem>> -> memref<1x64xf32, #tpu.memory_space<vmem>>
    %90 = tpu.memref_slice %arg16[%c1_i32_56] : memref<16x!tpu.dma_semaphore, #tpu.memory_space<semaphore_mem>> -> memref<1x!tpu.dma_semaphore, #tpu.memory_space<semaphore_mem>>
    %91 = tpu.memref_squeeze %90 : memref<1x!tpu.dma_semaphore, #tpu.memory_space<semaphore_mem>> -> memref<!tpu.dma_semaphore, #tpu.memory_space<semaphore_mem>>
    tpu.wait_dma2 semaphore(%91 : memref<!tpu.dma_semaphore, #tpu.memory_space<semaphore_mem>>) src(%88 : memref<1x64xf32, #tpu.memory_space<any>>) dst(%89 : memref<1x64xf32, #tpu.memory_space<vmem>>)
    %c2_i32_60 = arith.constant 2 : i32
    %c0_i32_61 = arith.constant 0 : i32
    %92 = tpu.memref_slice %arg3[%10, %c0_i32_61] : memref<128x64xf32, #tpu.memory_space<any>> -> memref<1x64xf32, #tpu.memory_space<any>>
    %c2_i32_62 = arith.constant 2 : i32
    %c0_i32_63 = arith.constant 0 : i32
    %93 = tpu.memref_slice %arg14[%c2_i32_62, %c0_i32_63] : memref<16x64xf32, #tpu.memory_space<vmem>> -> memref<1x64xf32, #tpu.memory_space<vmem>>
    %94 = tpu.memref_slice %arg16[%c2_i32_60] : memref<16x!tpu.dma_semaphore, #tpu.memory_space<semaphore_mem>> -> memref<1x!tpu.dma_semaphore, #tpu.memory_space<semaphore_mem>>
    %95 = tpu.memref_squeeze %94 : memref<1x!tpu.dma_semaphore, #tpu.memory_space<semaphore_mem>> -> memref<!tpu.dma_semaphore, #tpu.memory_space<semaphore_mem>>
    tpu.wait_dma2 semaphore(%95 : memref<!tpu.dma_semaphore, #tpu.memory_space<semaphore_mem>>) src(%92 : memref<1x64xf32, #tpu.memory_space<any>>) dst(%93 : memref<1x64xf32, #tpu.memory_space<vmem>>)
    %c3_i32_64 = arith.constant 3 : i32
    %c0_i32_65 = arith.constant 0 : i32
    %96 = tpu.memref_slice %arg3[%15, %c0_i32_65] : memref<128x64xf32, #tpu.memory_space<any>> -> memref<1x64xf32, #tpu.memory_space<any>>
    %c3_i32_66 = arith.constant 3 : i32
    %c0_i32_67 = arith.constant 0 : i32
    %97 = tpu.memref_slice %arg14[%c3_i32_66, %c0_i32_67] : memref<16x64xf32, #tpu.memory_space<vmem>> -> memref<1x64xf32, #tpu.memory_space<vmem>>
    %98 = tpu.memref_slice %arg16[%c3_i32_64] : memref<16x!tpu.dma_semaphore, #tpu.memory_space<semaphore_mem>> -> memref<1x!tpu.dma_semaphore, #tpu.memory_space<semaphore_mem>>
    %99 = tpu.memref_squeeze %98 : memref<1x!tpu.dma_semaphore, #tpu.memory_space<semaphore_mem>> -> memref<!tpu.dma_semaphore, #tpu.memory_space<semaphore_mem>>
    tpu.wait_dma2 semaphore(%99 : memref<!tpu.dma_semaphore, #tpu.memory_space<semaphore_mem>>) src(%96 : memref<1x64xf32, #tpu.memory_space<any>>) dst(%97 : memref<1x64xf32, #tpu.memory_space<vmem>>)
    %c4_i32_68 = arith.constant 4 : i32
    %c0_i32_69 = arith.constant 0 : i32
    %100 = tpu.memref_slice %arg3[%20, %c0_i32_69] : memref<128x64xf32, #tpu.memory_space<any>> -> memref<1x64xf32, #tpu.memory_space<any>>
    %c4_i32_70 = arith.constant 4 : i32
    %c0_i32_71 = arith.constant 0 : i32
    %101 = tpu.memref_slice %arg14[%c4_i32_70, %c0_i32_71] : memref<16x64xf32, #tpu.memory_space<vmem>> -> memref<1x64xf32, #tpu.memory_space<vmem>>
    %102 = tpu.memref_slice %arg16[%c4_i32_68] : memref<16x!tpu.dma_semaphore, #tpu.memory_space<semaphore_mem>> -> memref<1x!tpu.dma_semaphore, #tpu.memory_space<semaphore_mem>>
    %103 = tpu.memref_squeeze %102 : memref<1x!tpu.dma_semaphore, #tpu.memory_space<semaphore_mem>> -> memref<!tpu.dma_semaphore, #tpu.memory_space<semaphore_mem>>
    tpu.wait_dma2 semaphore(%103 : memref<!tpu.dma_semaphore, #tpu.memory_space<semaphore_mem>>) src(%100 : memref<1x64xf32, #tpu.memory_space<any>>) dst(%101 : memref<1x64xf32, #tpu.memory_space<vmem>>)
    %c5_i32_72 = arith.constant 5 : i32
    %c0_i32_73 = arith.constant 0 : i32
    %104 = tpu.memref_slice %arg3[%25, %c0_i32_73] : memref<128x64xf32, #tpu.memory_space<any>> -> memref<1x64xf32, #tpu.memory_space<any>>
    %c5_i32_74 = arith.constant 5 : i32
    %c0_i32_75 = arith.constant 0 : i32
    %105 = tpu.memref_slice %arg14[%c5_i32_74, %c0_i32_75] : memref<16x64xf32, #tpu.memory_space<vmem>> -> memref<1x64xf32, #tpu.memory_space<vmem>>
    %106 = tpu.memref_slice %arg16[%c5_i32_72] : memref<16x!tpu.dma_semaphore, #tpu.memory_space<semaphore_mem>> -> memref<1x!tpu.dma_semaphore, #tpu.memory_space<semaphore_mem>>
    %107 = tpu.memref_squeeze %106 : memref<1x!tpu.dma_semaphore, #tpu.memory_space<semaphore_mem>> -> memref<!tpu.dma_semaphore, #tpu.memory_space<semaphore_mem>>
    tpu.wait_dma2 semaphore(%107 : memref<!tpu.dma_semaphore, #tpu.memory_space<semaphore_mem>>) src(%104 : memref<1x64xf32, #tpu.memory_space<any>>) dst(%105 : memref<1x64xf32, #tpu.memory_space<vmem>>)
    %c6_i32_76 = arith.constant 6 : i32
    %c0_i32_77 = arith.constant 0 : i32
    %108 = tpu.memref_slice %arg3[%30, %c0_i32_77] : memref<128x64xf32, #tpu.memory_space<any>> -> memref<1x64xf32, #tpu.memory_space<any>>
    %c6_i32_78 = arith.constant 6 : i32
    %c0_i32_79 = arith.constant 0 : i32
    %109 = tpu.memref_slice %arg14[%c6_i32_78, %c0_i32_79] : memref<16x64xf32, #tpu.memory_space<vmem>> -> memref<1x64xf32, #tpu.memory_space<vmem>>
    %110 = tpu.memref_slice %arg16[%c6_i32_76] : memref<16x!tpu.dma_semaphore, #tpu.memory_space<semaphore_mem>> -> memref<1x!tpu.dma_semaphore, #tpu.memory_space<semaphore_mem>>
    %111 = tpu.memref_squeeze %110 : memref<1x!tpu.dma_semaphore, #tpu.memory_space<semaphore_mem>> -> memref<!tpu.dma_semaphore, #tpu.memory_space<semaphore_mem>>
    tpu.wait_dma2 semaphore(%111 : memref<!tpu.dma_semaphore, #tpu.memory_space<semaphore_mem>>) src(%108 : memref<1x64xf32, #tpu.memory_space<any>>) dst(%109 : memref<1x64xf32, #tpu.memory_space<vmem>>)
    %c7_i32_80 = arith.constant 7 : i32
    %c0_i32_81 = arith.constant 0 : i32
    %112 = tpu.memref_slice %arg3[%35, %c0_i32_81] : memref<128x64xf32, #tpu.memory_space<any>> -> memref<1x64xf32, #tpu.memory_space<any>>
    %c7_i32_82 = arith.constant 7 : i32
    %c0_i32_83 = arith.constant 0 : i32
    %113 = tpu.memref_slice %arg14[%c7_i32_82, %c0_i32_83] : memref<16x64xf32, #tpu.memory_space<vmem>> -> memref<1x64xf32, #tpu.memory_space<vmem>>
    %114 = tpu.memref_slice %arg16[%c7_i32_80] : memref<16x!tpu.dma_semaphore, #tpu.memory_space<semaphore_mem>> -> memref<1x!tpu.dma_semaphore, #tpu.memory_space<semaphore_mem>>
    %115 = tpu.memref_squeeze %114 : memref<1x!tpu.dma_semaphore, #tpu.memory_space<semaphore_mem>> -> memref<!tpu.dma_semaphore, #tpu.memory_space<semaphore_mem>>
    tpu.wait_dma2 semaphore(%115 : memref<!tpu.dma_semaphore, #tpu.memory_space<semaphore_mem>>) src(%112 : memref<1x64xf32, #tpu.memory_space<any>>) dst(%113 : memref<1x64xf32, #tpu.memory_space<vmem>>)
    %c8_i32_84 = arith.constant 8 : i32
    %c0_i32_85 = arith.constant 0 : i32
    %116 = tpu.memref_slice %arg3[%40, %c0_i32_85] : memref<128x64xf32, #tpu.memory_space<any>> -> memref<1x64xf32, #tpu.memory_space<any>>
    %c8_i32_86 = arith.constant 8 : i32
    %c0_i32_87 = arith.constant 0 : i32
    %117 = tpu.memref_slice %arg14[%c8_i32_86, %c0_i32_87] : memref<16x64xf32, #tpu.memory_space<vmem>> -> memref<1x64xf32, #tpu.memory_space<vmem>>
    %118 = tpu.memref_slice %arg16[%c8_i32_84] : memref<16x!tpu.dma_semaphore, #tpu.memory_space<semaphore_mem>> -> memref<1x!tpu.dma_semaphore, #tpu.memory_space<semaphore_mem>>
    %119 = tpu.memref_squeeze %118 : memref<1x!tpu.dma_semaphore, #tpu.memory_space<semaphore_mem>> -> memref<!tpu.dma_semaphore, #tpu.memory_space<semaphore_mem>>
    tpu.wait_dma2 semaphore(%119 : memref<!tpu.dma_semaphore, #tpu.memory_space<semaphore_mem>>) src(%116 : memref<1x64xf32, #tpu.memory_space<any>>) dst(%117 : memref<1x64xf32, #tpu.memory_space<vmem>>)
    %c9_i32_88 = arith.constant 9 : i32
    %c0_i32_89 = arith.constant 0 : i32
    %120 = tpu.memref_slice %arg3[%45, %c0_i32_89] : memref<128x64xf32, #tpu.memory_space<any>> -> memref<1x64xf32, #tpu.memory_space<any>>
    %c9_i32_90 = arith.constant 9 : i32
    %c0_i32_91 = arith.constant 0 : i32
    %121 = tpu.memref_slice %arg14[%c9_i32_90, %c0_i32_91] : memref<16x64xf32, #tpu.memory_space<vmem>> -> memref<1x64xf32, #tpu.memory_space<vmem>>
    %122 = tpu.memref_slice %arg16[%c9_i32_88] : memref<16x!tpu.dma_semaphore, #tpu.memory_space<semaphore_mem>> -> memref<1x!tpu.dma_semaphore, #tpu.memory_space<semaphore_mem>>
    %123 = tpu.memref_squeeze %122 : memref<1x!tpu.dma_semaphore, #tpu.memory_space<semaphore_mem>> -> memref<!tpu.dma_semaphore, #tpu.memory_space<semaphore_mem>>
    tpu.wait_dma2 semaphore(%123 : memref<!tpu.dma_semaphore, #tpu.memory_space<semaphore_mem>>) src(%120 : memref<1x64xf32, #tpu.memory_space<any>>) dst(%121 : memref<1x64xf32, #tpu.memory_space<vmem>>)
    %c10_i32_92 = arith.constant 10 : i32
    %c0_i32_93 = arith.constant 0 : i32
    %124 = tpu.memref_slice %arg3[%50, %c0_i32_93] : memref<128x64xf32, #tpu.memory_space<any>> -> memref<1x64xf32, #tpu.memory_space<any>>
    %c10_i32_94 = arith.constant 10 : i32
    %c0_i32_95 = arith.constant 0 : i32
    %125 = tpu.memref_slice %arg14[%c10_i32_94, %c0_i32_95] : memref<16x64xf32, #tpu.memory_space<vmem>> -> memref<1x64xf32, #tpu.memory_space<vmem>>
    %126 = tpu.memref_slice %arg16[%c10_i32_92] : memref<16x!tpu.dma_semaphore, #tpu.memory_space<semaphore_mem>> -> memref<1x!tpu.dma_semaphore, #tpu.memory_space<semaphore_mem>>
    %127 = tpu.memref_squeeze %126 : memref<1x!tpu.dma_semaphore, #tpu.memory_space<semaphore_mem>> -> memref<!tpu.dma_semaphore, #tpu.memory_space<semaphore_mem>>
    tpu.wait_dma2 semaphore(%127 : memref<!tpu.dma_semaphore, #tpu.memory_space<semaphore_mem>>) src(%124 : memref<1x64xf32, #tpu.memory_space<any>>) dst(%125 : memref<1x64xf32, #tpu.memory_space<vmem>>)
    %c11_i32_96 = arith.constant 11 : i32
    %c0_i32_97 = arith.constant 0 : i32
    %128 = tpu.memref_slice %arg3[%55, %c0_i32_97] : memref<128x64xf32, #tpu.memory_space<any>> -> memref<1x64xf32, #tpu.memory_space<any>>
    %c11_i32_98 = arith.constant 11 : i32
    %c0_i32_99 = arith.constant 0 : i32
    %129 = tpu.memref_slice %arg14[%c11_i32_98, %c0_i32_99] : memref<16x64xf32, #tpu.memory_space<vmem>> -> memref<1x64xf32, #tpu.memory_space<vmem>>
    %130 = tpu.memref_slice %arg16[%c11_i32_96] : memref<16x!tpu.dma_semaphore, #tpu.memory_space<semaphore_mem>> -> memref<1x!tpu.dma_semaphore, #tpu.memory_space<semaphore_mem>>
    %131 = tpu.memref_squeeze %130 : memref<1x!tpu.dma_semaphore, #tpu.memory_space<semaphore_mem>> -> memref<!tpu.dma_semaphore, #tpu.memory_space<semaphore_mem>>
    tpu.wait_dma2 semaphore(%131 : memref<!tpu.dma_semaphore, #tpu.memory_space<semaphore_mem>>) src(%128 : memref<1x64xf32, #tpu.memory_space<any>>) dst(%129 : memref<1x64xf32, #tpu.memory_space<vmem>>)
    %c12_i32_100 = arith.constant 12 : i32
    %c0_i32_101 = arith.constant 0 : i32
    %132 = tpu.memref_slice %arg3[%60, %c0_i32_101] : memref<128x64xf32, #tpu.memory_space<any>> -> memref<1x64xf32, #tpu.memory_space<any>>
    %c12_i32_102 = arith.constant 12 : i32
    %c0_i32_103 = arith.constant 0 : i32
    %133 = tpu.memref_slice %arg14[%c12_i32_102, %c0_i32_103] : memref<16x64xf32, #tpu.memory_space<vmem>> -> memref<1x64xf32, #tpu.memory_space<vmem>>
    %134 = tpu.memref_slice %arg16[%c12_i32_100] : memref<16x!tpu.dma_semaphore, #tpu.memory_space<semaphore_mem>> -> memref<1x!tpu.dma_semaphore, #tpu.memory_space<semaphore_mem>>
    %135 = tpu.memref_squeeze %134 : memref<1x!tpu.dma_semaphore, #tpu.memory_space<semaphore_mem>> -> memref<!tpu.dma_semaphore, #tpu.memory_space<semaphore_mem>>
    tpu.wait_dma2 semaphore(%135 : memref<!tpu.dma_semaphore, #tpu.memory_space<semaphore_mem>>) src(%132 : memref<1x64xf32, #tpu.memory_space<any>>) dst(%133 : memref<1x64xf32, #tpu.memory_space<vmem>>)
    %c13_i32_104 = arith.constant 13 : i32
    %c0_i32_105 = arith.constant 0 : i32
    %136 = tpu.memref_slice %arg3[%65, %c0_i32_105] : memref<128x64xf32, #tpu.memory_space<any>> -> memref<1x64xf32, #tpu.memory_space<any>>
    %c13_i32_106 = arith.constant 13 : i32
    %c0_i32_107 = arith.constant 0 : i32
    %137 = tpu.memref_slice %arg14[%c13_i32_106, %c0_i32_107] : memref<16x64xf32, #tpu.memory_space<vmem>> -> memref<1x64xf32, #tpu.memory_space<vmem>>
    %138 = tpu.memref_slice %arg16[%c13_i32_104] : memref<16x!tpu.dma_semaphore, #tpu.memory_space<semaphore_mem>> -> memref<1x!tpu.dma_semaphore, #tpu.memory_space<semaphore_mem>>
    %139 = tpu.memref_squeeze %138 : memref<1x!tpu.dma_semaphore, #tpu.memory_space<semaphore_mem>> -> memref<!tpu.dma_semaphore, #tpu.memory_space<semaphore_mem>>
    tpu.wait_dma2 semaphore(%139 : memref<!tpu.dma_semaphore, #tpu.memory_space<semaphore_mem>>) src(%136 : memref<1x64xf32, #tpu.memory_space<any>>) dst(%137 : memref<1x64xf32, #tpu.memory_space<vmem>>)
    %c14_i32_108 = arith.constant 14 : i32
    %c0_i32_109 = arith.constant 0 : i32
    %140 = tpu.memref_slice %arg3[%70, %c0_i32_109] : memref<128x64xf32, #tpu.memory_space<any>> -> memref<1x64xf32, #tpu.memory_space<any>>
    %c14_i32_110 = arith.constant 14 : i32
    %c0_i32_111 = arith.constant 0 : i32
    %141 = tpu.memref_slice %arg14[%c14_i32_110, %c0_i32_111] : memref<16x64xf32, #tpu.memory_space<vmem>> -> memref<1x64xf32, #tpu.memory_space<vmem>>
    %142 = tpu.memref_slice %arg16[%c14_i32_108] : memref<16x!tpu.dma_semaphore, #tpu.memory_space<semaphore_mem>> -> memref<1x!tpu.dma_semaphore, #tpu.memory_space<semaphore_mem>>
    %143 = tpu.memref_squeeze %142 : memref<1x!tpu.dma_semaphore, #tpu.memory_space<semaphore_mem>> -> memref<!tpu.dma_semaphore, #tpu.memory_space<semaphore_mem>>
    tpu.wait_dma2 semaphore(%143 : memref<!tpu.dma_semaphore, #tpu.memory_space<semaphore_mem>>) src(%140 : memref<1x64xf32, #tpu.memory_space<any>>) dst(%141 : memref<1x64xf32, #tpu.memory_space<vmem>>)
    %c15_i32_112 = arith.constant 15 : i32
    %c0_i32_113 = arith.constant 0 : i32
    %144 = tpu.memref_slice %arg3[%75, %c0_i32_113] : memref<128x64xf32, #tpu.memory_space<any>> -> memref<1x64xf32, #tpu.memory_space<any>>
    %c15_i32_114 = arith.constant 15 : i32
    %c0_i32_115 = arith.constant 0 : i32
    %145 = tpu.memref_slice %arg14[%c15_i32_114, %c0_i32_115] : memref<16x64xf32, #tpu.memory_space<vmem>> -> memref<1x64xf32, #tpu.memory_space<vmem>>
    %146 = tpu.memref_slice %arg16[%c15_i32_112] : memref<16x!tpu.dma_semaphore, #tpu.memory_space<semaphore_mem>> -> memref<1x!tpu.dma_semaphore, #tpu.memory_space<semaphore_mem>>
    %147 = tpu.memref_squeeze %146 : memref<1x!tpu.dma_semaphore, #tpu.memory_space<semaphore_mem>> -> memref<!tpu.dma_semaphore, #tpu.memory_space<semaphore_mem>>
    tpu.wait_dma2 semaphore(%147 : memref<!tpu.dma_semaphore, #tpu.memory_space<semaphore_mem>>) src(%144 : memref<1x64xf32, #tpu.memory_space<any>>) dst(%145 : memref<1x64xf32, #tpu.memory_space<vmem>>)
    %c0_116 = arith.constant 0 : index
    %c0_117 = arith.constant 0 : index
    %148 = vector.load %arg4[%c0_116, %c0_117] : memref<2x16xf32, #tpu.memory_space<vmem>>, vector<2x16xf32>
    %c0_118 = arith.constant 0 : index
    %c0_119 = arith.constant 0 : index
    %149 = vector.load %arg14[%c0_118, %c0_119] : memref<16x64xf32, #tpu.memory_space<vmem>>, vector<16x64xf32>
    %cst_120 = arith.constant dense<0.000000e+00> : vector<2x64xf32>
    %150 = tpu.matmul %148, %149, %cst_120 {dimension_numbers = #tpu.dot_dimension_numbers<[1], [0], [0], [1], [0, 0, 1, 1], [], []>} : vector<2x16xf32>, vector<16x64xf32>, vector<2x64xf32> -> vector<2x64xf32>
    %c0_121 = arith.constant 0 : index
    %c0_122 = arith.constant 0 : index
    %151 = vector.load %arg5[%c0_121, %c0_122] : memref<2x1xf32, #tpu.memory_space<vmem>>, vector<2x1xf32>
    %152 = tpu.reciprocal %151 {approx = true} : vector<2x1xf32> -> vector<2x1xf32>
    %153 = vector.broadcast %152 : vector<2x1xf32> to vector<2x64xf32>
    %154 = arith.mulf %150, %153 : vector<2x64xf32>
    %cst_123 = arith.constant 0.000000e+00 : f32
    %155 = vector.broadcast %cst_123 : f32 to vector<4x128xf32>
    %c0_124 = arith.constant 0 : index
    %c0_125 = arith.constant 0 : index
    %156 = vector.load %arg15[%c0_124, %c0_125] : memref<4x128xf32, #tpu.memory_space<vmem>>, vector<4x128xf32>
    tpu.vector_store %arg15[%c0_124, %c0_125], %155 {strides = array<i32>} : memref<4x128xf32, #tpu.memory_space<vmem>>, vector<4x128xf32>,
    %c0_126 = arith.constant 0 : index
    %c0_127 = arith.constant 0 : index
    %157 = vector.load %arg15[%c0_126, %c0_127] : memref<4x128xf32, #tpu.memory_space<vmem>>, vector<2x64xf32>
    tpu.vector_store %arg15[%c0_126, %c0_127], %83 {strides = array<i32>} : memref<4x128xf32, #tpu.memory_space<vmem>>, vector<2x64xf32>,
    %c2_128 = arith.constant 2 : index
    %c64 = arith.constant 64 : index
    %158 = vector.load %arg15[%c2_128, %c64] : memref<4x128xf32, #tpu.memory_space<vmem>>, vector<2x64xf32>
    tpu.vector_store %arg15[%c2_128, %c64], %154 {strides = array<i32>} : memref<4x128xf32, #tpu.memory_space<vmem>>, vector<2x64xf32>,
    %c0_129 = arith.constant 0 : index
    %c0_130 = arith.constant 0 : index
    %159 = vector.load %arg15[%c0_129, %c0_130] : memref<4x128xf32, #tpu.memory_space<vmem>>, vector<4x128xf32>
    %c0_131 = arith.constant 0 : index
    %c0_132 = arith.constant 0 : index
    %160 = vector.load %arg6[%c0_131, %c0_132] : memref<128x128xf32, #tpu.memory_space<vmem>>, vector<128x128xf32>
    %cst_133 = arith.constant dense<0.000000e+00> : vector<4x128xf32>
    %161 = tpu.matmul %159, %160, %cst_133 {dimension_numbers = #tpu.dot_dimension_numbers<[1], [0], [0], [1], [0, 0, 1, 1], [], []>} : vector<4x128xf32>, vector<128x128xf32>, vector<4x128xf32> -> vector<4x128xf32>
    %c0_134 = arith.constant 0 : index
    %c0_135 = arith.constant 0 : index
    %162 = vector.load %arg7[%c0_134, %c0_135] : memref<4x128xf32, #tpu.memory_space<vmem>>, vector<4x128xf32>
    %163 = arith.addf %161, %162 : vector<4x128xf32>
    %cst_136 = arith.constant 5.000000e-01 : f32
    %164 = vector.broadcast %cst_136 : f32 to vector<4x128xf32>
    %165 = arith.mulf %164, %163 : vector<4x128xf32>
    %cst_137 = arith.constant 4.471500e-02 : f32
    %166 = vector.broadcast %cst_137 : f32 to vector<4x128xf32>
    %167 = arith.mulf %166, %163 : vector<4x128xf32>
    %168 = arith.mulf %167, %163 : vector<4x128xf32>
    %169 = arith.mulf %168, %163 : vector<4x128xf32>
    %170 = arith.addf %163, %169 : vector<4x128xf32>
    %cst_138 = arith.constant 0.797884583 : f32
    %171 = vector.broadcast %cst_138 : f32 to vector<4x128xf32>
    %172 = arith.mulf %171, %170 : vector<4x128xf32>
    %173 = math.tanh %172 : vector<4x128xf32>
    %cst_139 = arith.constant 1.000000e+00 : f32
    %174 = vector.broadcast %cst_139 : f32 to vector<4x128xf32>
    %175 = arith.addf %174, %173 : vector<4x128xf32>
    %176 = arith.mulf %165, %175 : vector<4x128xf32>
    %c0_140 = arith.constant 0 : index
    %c0_141 = arith.constant 0 : index
    %177 = vector.load %arg8[%c0_140, %c0_141] : memref<128x128xf32, #tpu.memory_space<vmem>>, vector<128x128xf32>
    %cst_142 = arith.constant dense<0.000000e+00> : vector<4x128xf32>
    %178 = tpu.matmul %176, %177, %cst_142 {dimension_numbers = #tpu.dot_dimension_numbers<[1], [0], [0], [1], [0, 0, 1, 1], [], []>} : vector<4x128xf32>, vector<128x128xf32>, vector<4x128xf32> -> vector<4x128xf32>
    %c0_143 = arith.constant 0 : index
    %c0_144 = arith.constant 0 : index
    %179 = vector.load %arg9[%c0_143, %c0_144] : memref<4x128xf32, #tpu.memory_space<vmem>>, vector<4x128xf32>
    %180 = arith.addf %178, %179 : vector<4x128xf32>
    %181 = arith.addf %180, %163 : vector<4x128xf32>
    %cst_145 = arith.constant dense<0.000000e+00> : vector<4xf32>
    %182 = vector.multi_reduction <add>, %181, %cst_145 [1] : vector<4x128xf32> to vector<4xf32>
    %183 = vector.shape_cast %182 : vector<4xf32> to vector<4x1xf32>
    %cst_146 = arith.constant 3.125000e-02 : f32
    %184 = vector.broadcast %cst_146 : f32 to vector<4x1xf32>
    %185 = arith.mulf %183, %184 : vector<4x1xf32>
    %186 = vector.broadcast %185 : vector<4x1xf32> to vector<4x128xf32>
    %187 = arith.subf %181, %186 : vector<4x128xf32>
    %c0_147 = arith.constant 0 : index
    %c0_148 = arith.constant 0 : index
    %188 = vector.load %arg12[%c0_147, %c0_148] : memref<4x128xf32, #tpu.memory_space<vmem>>, vector<4x128xf32>
    %189 = arith.mulf %187, %188 : vector<4x128xf32>
    %190 = arith.mulf %189, %189 : vector<4x128xf32>
    %cst_149 = arith.constant dense<0.000000e+00> : vector<4xf32>
    %191 = vector.multi_reduction <add>, %190, %cst_149 [1] : vector<4x128xf32> to vector<4xf32>
    %192 = vector.shape_cast %191 : vector<4xf32> to vector<4x1xf32>
    %cst_150 = arith.constant 3.125000e-02 : f32
    %193 = vector.broadcast %cst_150 : f32 to vector<4x1xf32>
    %194 = arith.mulf %192, %193 : vector<4x1xf32>
    %cst_151 = arith.constant 9.99999974E-6 : f32
    %195 = vector.broadcast %cst_151 : f32 to vector<4x1xf32>
    %196 = arith.addf %194, %195 : vector<4x1xf32>
    %197 = math.rsqrt %196 : vector<4x1xf32>
    %198 = vector.broadcast %197 : vector<4x1xf32> to vector<4x128xf32>
    %199 = arith.mulf %189, %198 : vector<4x128xf32>
    %c0_152 = arith.constant 0 : index
    %c0_153 = arith.constant 0 : index
    %200 = vector.load %arg10[%c0_152, %c0_153] : memref<4x128xf32, #tpu.memory_space<vmem>>, vector<4x128xf32>
    %201 = arith.mulf %199, %200 : vector<4x128xf32>
    %c0_154 = arith.constant 0 : index
    %c0_155 = arith.constant 0 : index
    %202 = vector.load %arg11[%c0_154, %c0_155] : memref<4x128xf32, #tpu.memory_space<vmem>>, vector<4x128xf32>
    %203 = arith.addf %201, %202 : vector<4x128xf32>
    %c0_156 = arith.constant 0 : index
    %c0_157 = arith.constant 0 : index
    %204 = vector.load %arg13[%c0_156, %c0_157] : memref<4x128xf32, #tpu.memory_space<vmem>>, vector<4x128xf32>
    tpu.vector_store %arg13[%c0_156, %c0_157], %203 {strides = array<i32>} : memref<4x128xf32, #tpu.memory_space<vmem>>, vector<4x128xf32>,
    return
  }
  func.func @transform_0(%arg0: i32, %arg1: memref<16xi32, #tpu.memory_space<smem>>) -> (i32, i32, i32) {
    %c0_i32 = arith.constant 0 : i32
    %c0_i32_0 = arith.constant 0 : i32
    %c0_i32_1 = arith.constant 0 : i32
    %c0_i32_2 = arith.constant 0 : i32
    return %c0_i32, %c0_i32_0, %c0_i32_1 : i32, i32, i32
  }
  func.func @transform_2(%arg0: i32, %arg1: memref<16xi32, #tpu.memory_space<smem>>) -> (i32, i32) {
    %c0_i32 = arith.constant 0 : i32
    %c0_i32_0 = arith.constant 0 : i32
    %c0_i32_1 = arith.constant 0 : i32
    return %c0_i32, %c0_i32_0 : i32, i32
  }
  func.func @transform_3(%arg0: i32, %arg1: memref<16xi32, #tpu.memory_space<smem>>) -> (i32, i32) {
    %c0_i32 = arith.constant 0 : i32
    %c0_i32_0 = arith.constant 0 : i32
    %c0_i32_1 = arith.constant 0 : i32
    return %c0_i32, %c0_i32_0 : i32, i32
  }
  func.func @transform_4(%arg0: i32, %arg1: memref<16xi32, #tpu.memory_space<smem>>) -> (i32, i32) {
    %c0_i32 = arith.constant 0 : i32
    %c0_i32_0 = arith.constant 0 : i32
    %c0_i32_1 = arith.constant 0 : i32
    return %c0_i32, %c0_i32_0 : i32, i32
  }
  func.func @transform_5(%arg0: i32, %arg1: memref<16xi32, #tpu.memory_space<smem>>) -> (i32, i32) {
    %c0_i32 = arith.constant 0 : i32
    %c0_i32_0 = arith.constant 0 : i32
    %c0_i32_1 = arith.constant 0 : i32
    return %c0_i32, %c0_i32_0 : i32, i32
  }
  func.func @transform_6(%arg0: i32, %arg1: memref<16xi32, #tpu.memory_space<smem>>) -> (i32, i32) {
    %c0_i32 = arith.constant 0 : i32
    %c0_i32_0 = arith.constant 0 : i32
    %c0_i32_1 = arith.constant 0 : i32
    return %c0_i32, %c0_i32_0 : i32, i32
  }
  func.func @transform_7(%arg0: i32, %arg1: memref<16xi32, #tpu.memory_space<smem>>) -> (i32, i32) {
    %c0_i32 = arith.constant 0 : i32
    %c0_i32_0 = arith.constant 0 : i32
    %c0_i32_1 = arith.constant 0 : i32
    return %c0_i32, %c0_i32_0 : i32, i32
  }
  func.func @transform_8(%arg0: i32, %arg1: memref<16xi32, #tpu.memory_space<smem>>) -> (i32, i32) {
    %c0_i32 = arith.constant 0 : i32
    %c0_i32_0 = arith.constant 0 : i32
    %c0_i32_1 = arith.constant 0 : i32
    return %c0_i32, %c0_i32_0 : i32, i32
  }
  func.func @transform_9(%arg0: i32, %arg1: memref<16xi32, #tpu.memory_space<smem>>) -> (i32, i32) {
    %c0_i32 = arith.constant 0 : i32
    %c0_i32_0 = arith.constant 0 : i32
    %c0_i32_1 = arith.constant 0 : i32
    return %c0_i32, %c0_i32_0 : i32, i32
  }
  func.func @transform_10(%arg0: i32, %arg1: memref<16xi32, #tpu.memory_space<smem>>) -> (i32, i32) {
    %c0_i32 = arith.constant 0 : i32
    %c0_i32_0 = arith.constant 0 : i32
    %c0_i32_1 = arith.constant 0 : i32
    return %c0_i32, %c0_i32_0 : i32, i32
  }
  func.func @transform_11(%arg0: i32, %arg1: memref<16xi32, #tpu.memory_space<smem>>) -> (i32, i32) {
    %c0_i32 = arith.constant 0 : i32
    %c0_i32_0 = arith.constant 0 : i32
    %c0_i32_1 = arith.constant 0 : i32
    return %c0_i32, %c0_i32_0 : i32, i32
  }
}

</mosaic_0001>

<bundles_post_ra>
// kernel: tpu_custom_call.1
= control target key start
LH: loop header
LB: loop body
LE: loop exit
PB: predicated region body
PF: predicated region fallthrough
CT: control target
= control target key end

     0   :  { %s2349_s0 = inlined_call_operand.vmem [shape: s32[16], index: 0, kind: input, shape index: {}]   ;;  %s2350_s1 = inlined_call_operand.hbm [shape: f32[2,64,256], index: 1, kind: input, shape index: {}]   ;;  %s2351_s2 = inlined_call_operand.vmem [shape: f32[128,64], index: 2, kind: input, shape index: {}]   ;;  %s2352_s3 = inlined_call_operand.vmem [shape: f32[2,16], index: 3, kind: input, shape index: {}]   ;;  %s2353_s4 = inlined_call_operand.vmem [shape: f32[2,1], index: 4, kind: input, shape index: {}]   ;;  %s2354_s5 = inlined_call_operand.vmem [shape: f32[128,128], index: 5, kind: input, shape index: {}]   ;;  %s2355_s6 = inlined_call_operand.vmem [shape: f32[4,128], index: 6, kind: input, shape index: {}]   ;;  %s2356_s7 = inlined_call_operand.hbm [shape: f32[128,128], index: 7, kind: input, shape index: {}]   ;;  %s2357_s8 = inlined_call_operand.vmem [shape: f32[4,128], index: 8, kind: input, shape index: {}]   ;;  %s2358_s9 = inlined_call_operand.vmem [shape: f32[4,128], index: 9, kind: input, shape index: {}]   ;;  %s2359_s10 = inlined_call_operand.vmem [shape: f32[4,128], index: 10, kind: input, shape index: {}]   ;;  %s2360_s11 = inlined_call_operand.vmem [shape: f32[4,128], index: 11, kind: input, shape index: {}]   ;;  %s2361_s12 = inlined_call_operand.hbm [shape: f32[4,128], index: 12, kind: output, shape index: {}]  }
   0x1   :  { %s17_s23 = sshll.u32 %s2349_s0, 4  ;;  %s18_s23 = int_to_ptr.vmem [resolvable:$true] %s17_s23 }
   0x2   :  { %s1915_s24 = scalar_lea.vmem %s18_s23, 16  ;;  %p1920_p1 = scmp.lt.s32.totalorder %s18_s23, %s18_s23 }
   0x3   :  { %p1916_p0 = scmp.ne.s32.totalorder %s18_s23, %s1915_s24  ;;  %p1921_p2 = scmp.lt.s32.totalorder %s1915_s24, %s1915_s24 }
   0x5   :  { %p1922_p3 = por %p1921_p2, %p1920_p1 }
   0x7   :  { %p1923_p4 = pnand %p1922_p3, %p1916_p0 }
   0x9   :  { %1926 = shalt.err (!%p1923_p4)  }
   0xa   :  { %s2033_s25 = smov [#allocation6]  }
   0xb   :  { %20 = dma.vmem_to_smem %s18_s23, 16, %s2033_s25, [#allocation5] }
   0xc   :  { %1993 = dma.done.wait [#allocation5], 16 }
   0xd   :  { %1994 = vsyncadd [#allocation5], 4294967280 }
   0xe   :  { %22 = sfence }
   0xf   :  { %23 = vsyncpa [#allocation8], 0 }
  0x10   :  { %24 = vsyncpa [#allocation11], 0 }
  0x11   :  { %25 = vsyncpa [#allocation9], 0  ;;  %s2034_s26 = smov [#allocation7]   ;;  %s1927_s29 = scalar_lea.hbm %s2350_s1, 4096 }
  0x12   :  { %s31_s27 = sshll.u32 %s2034_s26, 4  ;;  %p1928_p5 = scmp.ne.s32.totalorder %s2350_s1, %s1927_s29  ;;  %s32_s27 = int_to_ptr.vmem [resolvable:$true] %s31_s27 }
  0x13   :  { %p1931_p6 = scmp.lt.u32.totalorder %s1927_s29, %s2350_s1 }
  0x15   :  { %p1933_p7 = pnand %p1931_p6, %p1928_p5 }
  0x17   :  { %1936 = shalt.err (!%p1933_p7)
}
  0x18   :  { %s1937_s16 = scalar_lea.vmem %s32_s27, 4096  ;;  %p1942_p9 = scmp.lt.s32.totalorder %s32_s27, %s32_s27 }
  0x19   :  { %p1938_p8 = scmp.ne.s32.totalorder %s32_s27, %s1937_s16  ;;  %p1943_p10 = scmp.lt.s32.totalorder %s1937_s16, %s1937_s16 }
  0x1b   :  { %p1944_p11 = por %p1943_p10, %p1942_p9 }
  0x1d   :  { %p1945_p12 = pnand %p1944_p11, %p1938_p8 }
  0x1f   :  { %1948 = shalt.err (!%p1945_p12)
}
  0x20   :  { %s2035_s17 = smov 256   ;;  %s2036_s18 = smov 16  }
  0x21   :  { %37 = dma.hbm_to_vmem [thread:$0]  %s2350_s1, 4096, %s32_s27, [#allocation8], %s2035_s17, %s2035_s17, %s2036_s18  }
  0x22   :  { %s2037_s21 = smov [#allocation10]   ;;  %s1949_s25 = scalar_lea.hbm %s2356_s7, 2048 }
  0x23   :  { %s51_s22 = sshll.u32 %s2037_s21, 4  ;;  %p1950_p13 = scmp.ne.s32.totalorder %s2356_s7, %s1949_s25  ;;  %s52_s22 = int_to_ptr.vmem [resolvable:$true] %s51_s22 }
  0x24   :  { %p1953_p0 = scmp.lt.u32.totalorder %s1949_s25, %s2356_s7 }
  0x26   :  { %p1955_p1 = pnand %p1953_p0, %p1950_p13 }
  0x28   :  { %1958 = shalt.err (!%p1955_p1)
}
  0x29   :  { %s1959_s30 = scalar_lea.vmem %s52_s22, 2048  ;;  %p1964_p3 = scmp.lt.s32.totalorder %s52_s22, %s52_s22 }
  0x2a   :  { %p1960_p2 = scmp.ne.s32.totalorder %s52_s22, %s1959_s30  ;;  %p1965_p4 = scmp.lt.s32.totalorder %s1959_s30, %s1959_s30 }
  0x2c   :  { %p1966_p5 = por %p1965_p4, %p1964_p3 }
  0x2e   :  { %p1967_p6 = pnand %p1966_p5, %p1960_p2 }
  0x30   :  { %1970 = shalt.err (!%p1967_p6)
}
  0x31   :  { %s2038_s1 = smov 128   ;;  %s2039_s27 = smov 8  }
  0x32   :  { %57 = dma.hbm_to_vmem [thread:$0]  %s2356_s7, 2048, %s52_s22, [#allocation11], %s2038_s1, %s2038_s1, %s2039_s27  }
  0x33   :  { %1995 = dma.done.wait [#allocation8], 4096  }
  0x34   :  { %1996 = vsyncadd [#allocation8], 4294963200 }
  0x35   :  { %1997 = dma.done.wait [#allocation11], 2048  }
  0x36   :  { %1998 = vsyncadd [#allocation11], 4294965248  ;;  %s72_s15 = sld [smem:[#allocation6]] }
  0x3c   :  { %s73_s18 = scalar_lea.vmem %s2351_s2, %s72_s15 }
  0x3d   :  { %v91_v0 = vld [vmem:[%s73_s18] sm:$0x1] }
  0x3e   :  { %92 = vst [vmem:[#allocation2] sm:$0x1] %v91_v0 }
  0x3f   :  { %117 = vsyncadd [#allocation4], 16  ;;  %s1698_s19 = sld [smem:[#allocation6 + $0x1]] }
  0x45   :  { %s119_s23 = scalar_lea.vmem %s2351_s2, %s1698_s19 }
  0x46   :  { %v139_v1 = vld [vmem:[%s119_s23] sm:$0x1] }
  0x47   :  { %140 = vst [vmem:[#allocation2 + $0x1] sm:$0x1] %v139_v1 }
  0x48   :  { %165 = vsyncadd [#allocation4 + $0x1], 16  ;;  %s1699_s7 = sld [smem:[#allocation6 + $0x2]] }
  0x4e   :  { %s167_s25 = scalar_lea.vmem %s2351_s2, %s1699_s7 }
  0x4f   :  { %v187_v2 = vld [vmem:[%s167_s25] sm:$0x1] }
  0x50   :  { %188 = vst [vmem:[#allocation2 + $0x2] sm:$0x1] %v187_v2 }
  0x51   :  { %213 = vsyncadd [#allocation4 + $0x2], 16  ;;  %s1700_s26 = sld [smem:[#allocation6 + $0x3]] }
  0x57   :  { %s215_s29 = scalar_lea.vmem %s2351_s2, %s1700_s26 }
  0x58   :  { %v235_v3 = vld [vmem:[%s215_s29] sm:$0x1] }
  0x59   :  { %236 = vst [vmem:[#allocation2 + $0x3] sm:$0x1] %v235_v3 }
  0x5a   :  { %261 = vsyncadd [#allocation4 + $0x3], 16  ;;  %s1701_s30 = sld [smem:[#allocation6 + $0x4]] }
  0x60   :  { %s263_s13 = scalar_lea.vmem %s2351_s2, %s1701_s30 }
  0x61   :  { %v283_v4 = vld [vmem:[%s263_s13] sm:$0x1] }
  0x62   :  { %284 = vst [vmem:[#allocation2 + $0x4] sm:$0x1] %v283_v4 }
  0x63   :  { %309 = vsyncadd [#allocation4 + $0x4], 16  ;;  %s1702_s14 = sld [smem:[#allocation6 + $0x5]] }
  0x69   :  { %s311_s17 = scalar_lea.vmem %s2351_s2, %s1702_s14 }
  0x6a   :  { %v331_v5 = vld [vmem:[%s311_s17] sm:$0x1] }
  0x6b   :  { %332 = vst [vmem:[#allocation2 + $0x5] sm:$0x1] %v331_v5 }
  0x6c   :  { %357 = vsyncadd [#allocation4 + $0x5], 16  ;;  %s1703_s18 = sld [smem:[#allocation6 + $0x6]] }
  0x72   :  { %s359_s21 = scalar_lea.vmem %s2351_s2, %s1703_s18 }
  0x73   :  { %v379_v6 = vld [vmem:[%s359_s21] sm:$0x1] }
  0x74   :  { %380 = vst [vmem:[#allocation2 + $0x6] sm:$0x1] %v379_v6 }
  0x75   :  { %405 = vsyncadd [#allocation4 + $0x6], 16  ;;  %s1704_s23 = sld [smem:[#allocation6 + $0x7]] }
  0x7b   :  { %s407_s24 = scalar_lea.vmem %s2351_s2, %s1704_s23 }
  0x7c   :  { %v427_v7 = vld [vmem:[%s407_s24] sm:$0x1] }
  0x7d   :  { %428 = vst [vmem:[#allocation2 + $0x7] sm:$0x1] %v427_v7 }
  0x7e   :  { %453 = vsyncadd [#allocation4 + $0x7], 16  ;;  %s1705_s25 = sld [smem:[#allocation6 + $0x8]] }
  0x84   :  { %s455_s28 = scalar_lea.vmem %s2351_s2, %s1705_s25 }
  0x85   :  { %v475_v8 = vld [vmem:[%s455_s28] sm:$0x1] }
  0x86   :  { %476 = vst [vmem:[#allocation2 + $0x8] sm:$0x1] %v475_v8 }
  0x87   :  { %501 = vsyncadd [#allocation4 + $0x8], 16  ;;  %s1706_s29 = sld [smem:[#allocation6 + $0x9]] }
  0x8d   :  { %s503_s27 = scalar_lea.vmem %s2351_s2, %s1706_s29 }
  0x8e   :  { %v523_v9 = vld [vmem:[%s503_s27] sm:$0x1] }
  0x8f   :  { %524 = vst [vmem:[#allocation2 + $0x9] sm:$0x1] %v523_v9 }
  0x90   :  { %549 = vsyncadd [#allocation4 + $0x9], 16  ;;  %s1707_s13 = sld [smem:[#allocation6 + $0xa]] }
  0x96   :  { %s551_s16 = scalar_lea.vmem %s2351_s2, %s1707_s13 }
  0x97   :  { %v571_v10 = vld [vmem:[%s551_s16] sm:$0x1] }
  0x98   :  { %572 = vst [vmem:[#allocation2 + $0xa] sm:$0x1] %v571_v10 }
  0x99   :  { %597 = vsyncadd [#allocation4 + $0xa], 16  ;;  %s1708_s17 = sld [smem:[#allocation6 + $0xb]] }
  0x9f   :  { %s599_s20 = scalar_lea.vmem %s2351_s2, %s1708_s17 }
  0xa0   :  { %v619_v11 = vld [vmem:[%s599_s20] sm:$0x1] }
  0xa1   :  { %620 = vst [vmem:[#allocation2 + $0xb] sm:$0x1] %v619_v11 }
  0xa2   :  { %645 = vsyncadd [#allocation4 + $0xb], 16  ;;  %s1709_s21 = sld [smem:[#allocation6 + $0xc]] }
  0xa8   :  { %s647_s22 = scalar_lea.vmem %s2351_s2, %s1709_s21 }
  0xa9   :  { %v667_v12 = vld [vmem:[%s647_s22] sm:$0x1] }
  0xaa   :  { %668 = vst [vmem:[#allocation2 + $0xc] sm:$0x1] %v667_v12 }
  0xab   :  { %693 = vsyncadd [#allocation4 + $0xc], 16  ;;  %s1710_s24 = sld [smem:[#allocation6 + $0xd]] }
  0xb1   :  { %s695_s0 = scalar_lea.vmem %s2351_s2, %s1710_s24 }
  0xb2   :  { %v715_v13 = vld [vmem:[%s695_s0] sm:$0x1] }
  0xb3   :  { %716 = vst [vmem:[#allocation2 + $0xd] sm:$0x1] %v715_v13 }
  0xb4   :  { %741 = vsyncadd [#allocation4 + $0xd], 16  ;;  %s1711_s28 = sld [smem:[#allocation6 + $0xe]] }
  0xba   :  { %s743_s1 = scalar_lea.vmem %s2351_s2, %s1711_s28 }
  0xbb   :  { %v763_v14 = vld [vmem:[%s743_s1] sm:$0x1] }
  0xbc   :  { %764 = vst [vmem:[#allocation2 + $0xe] sm:$0x1] %v763_v14 }
  0xbd   :  { %789 = vsyncadd [#allocation4 + $0xe], 16  ;;  %s1712_s27 = sld [smem:[#allocation6 + $0xf]]  ;;  %v842_v16 = vld [vmem:[#allocation7 + $0x20] sm:$0xff]  ;;  %v843_v17 = vld [vmem:[#allocation7 + $0x28] sm:$0xff] }
  0xbe   :  { %v838_v18 = vld [vmem:[#allocation7] sm:$0xff]  ;;  %v876_v19 = vadd.f32 %v843_v17, %v842_v16  ;;  %v839_v20 = vld [vmem:[#allocation7 + $0x8] sm:$0xff]  ;;  %v844_v21 = vld [vmem:[#allocation7 + $0x30] sm:$0xff] }
  0xbf   :  { %v845_v22 = vld [vmem:[#allocation7 + $0x38] sm:$0xff]  ;;  %v870_v23 = vadd.f32 %v839_v20, %v838_v18  ;;  %v840_v24 = vld [vmem:[#allocation7 + $0x10] sm:$0xff]  ;;  %v846_v30 = vld [vmem:[#allocation7 + $0x40] sm:$0xff] }
  0xc0   :  { %v841_v25 = vld [vmem:[#allocation7 + $0x18] sm:$0xff]  ;;  %877 = vadd.xlane.f32.xlu1 %v876_v19  ;;  %v879_v26 = vadd.f32 %v845_v22, %v844_v21  ;;  %v848_v28 = vld [vmem:[#allocation7 + $0x50] sm:$0xff]  ;;  %v847_v31 = vld [vmem:[#allocation7 + $0x48] sm:$0xff] }
  0xc1   :  { %871 = vadd.xlane.f32.xlu0 %v870_v23  ;;  %v873_v27 = vadd.f32 %v841_v25, %v840_v24  ;;  %v849_v29 = vld [vmem:[#allocation7 + $0x58] sm:$0xff]  ;;  %v882_v33 = vadd.f32 %v847_v31, %v846_v30  ;;  %v852_v34 = vld [vmem:[#allocation7 + $0x70] sm:$0xff]  ;;  %v850_v36 = vld [vmem:[#allocation7 + $0x60] sm:$0xff] }
  0xc2   :  { %v885_v32 = vadd.f32 %v849_v29, %v848_v28  ;;  %v853_v35 = vld [vmem:[#allocation7 + $0x78] sm:$0xff]  ;;  %v851_v37 = vld [vmem:[#allocation7 + $0x68] sm:$0xff] }
  0xc3   :  { %s791_s15 = scalar_lea.vmem %s2351_s2, %s1712_s27 }
  0xc4   :  { %v811_v15 = vld [vmem:[%s791_s15] sm:$0x1]  ;;  %880 = vadd.xlane.f32.xlu1 %v879_v26 }
  0xc5   :  { %812 = vst [vmem:[#allocation2 + $0xf] sm:$0x1] %v811_v15  ;;  %874 = vadd.xlane.f32.xlu0 %v873_v27 }
  0xc6   :  { %837 = vsyncadd [#allocation4 + $0xf], 16  ;;  %v891_v38 = vadd.f32 %v853_v35, %v852_v34  ;;  %v888_v39 = vadd.f32 %v851_v37, %v850_v36  ;;  %v856_v40 = vld [vmem:[#allocation7 + $0x90] sm:$0xff]  ;;  %v857_v41 = vld [vmem:[#allocation7 + $0x98] sm:$0xff] }
  0xc7   :  { %v854_v42 = vld [vmem:[#allocation7 + $0x80] sm:$0xff]  ;;  %v855_v43 = vld [vmem:[#allocation7 + $0x88] sm:$0xff]  ;;  %v897_v44 = vadd.f32 %v857_v41, %v856_v40  ;;  %v860_v46 = vld [vmem:[#allocation7 + $0xb0] sm:$0xff] }
  0xc8   :  { %886 = vadd.xlane.f32.xlu1 %v885_v32  ;;  %v894_v45 = vadd.f32 %v855_v43, %v854_v42  ;;  %v861_v47 = vld [vmem:[#allocation7 + $0xb8] sm:$0xff]  ;;  %v858_v48 = vld [vmem:[#allocation7 + $0xa0] sm:$0xff]  ;;  %v859_v49 = vld [vmem:[#allocation7 + $0xa8] sm:$0xff] }
  0xc9   :  { %883 = vadd.xlane.f32.xlu0 %v882_v33  ;;  %v903_v50 = vadd.f32 %v861_v47, %v860_v46  ;;  %v900_v51 = vadd.f32 %v859_v49, %v858_v48  ;;  %v864_v52 = vld [vmem:[#allocation7 + $0xd0] sm:$0xff]  ;;  %v865_v53 = vld [vmem:[#allocation7 + $0xd8] sm:$0xff]  ;;  %v862_v54 = vld [vmem:[#allocation7 + $0xc0] sm:$0xff] }
  0xca   :  { %v863_v55 = vld [vmem:[#allocation7 + $0xc8] sm:$0xff]  ;;  %v909_v56 = vadd.f32 %v865_v53, %v864_v52  ;;  %v868_v58 = vld [vmem:[#allocation7 + $0xf0] sm:$0xff]  ;;  %v869_v59 = vld [vmem:[#allocation7 + $0xf8] sm:$0xff] }
  0xcb   :  { %v906_v57 = vadd.f32 %v863_v55, %v862_v54  ;;  %v866_v60 = vld [vmem:[#allocation7 + $0xe0] sm:$0xff]  ;;  %v867_v61 = vld [vmem:[#allocation7 + $0xe8] sm:$0xff]  ;;  %v915_v62 = vadd.f32 %v869_v59, %v868_v58 }
  0xcc   :  { %892 = vadd.xlane.f32.xlu1 %v891_v38  ;;  %v912_v63 = vadd.f32 %v867_v61, %v866_v60 }
  0xcd   :  { %889 = vadd.xlane.f32.xlu0 %v888_v39 }
  0xd0   :  { %898 = vadd.xlane.f32.xlu1 %v897_v44 }
  0xd1   :  { %895 = vadd.xlane.f32.xlu0 %v894_v45 }
  0xd4   :  { %904 = vadd.xlane.f32.xlu1 %v903_v50 }
  0xd5   :  { %901 = vadd.xlane.f32.xlu0 %v900_v51 }
  0xd8   :  { %910 = vadd.xlane.f32.xlu1 %v909_v56 }
  0xd9   :  { %907 = vadd.xlane.f32.xlu0 %v906_v57 }
  0xdc   :  { %916 = vadd.xlane.f32.xlu1 %v915_v62 }
  0xdd   :  { %913 = vadd.xlane.f32.xlu0 %v912_v63 }
 0x14d   :  { %v878_v0 = vpop.xlane.xlu1 %877 }
 0x14e   :  { %v2186_v1 = vmul.f32 0.00390625, %v878_v0  ;;  %v872_v2 = vpop.xlane.xlu0 %871 }
 0x14f   :  { %v2188_v3 = vmul.f32 0.00390625, %v872_v2 }
 0x151   :  { %v881_v4 = vpop.xlane.xlu1 %880 }
 0x152   :  { %v2190_v5 = vmul.f32 0.00390625, %v881_v4  ;;  %v875_v6 = vpop.xlane.xlu0 %874 }
 0x153   :  { %v2192_v7 = vmul.f32 0.00390625, %v875_v6 }
 0x155   :  { %v887_v8 = vpop.xlane.xlu1 %886 }
 0x156   :  { %v2194_v9 = vmul.f32 0.00390625, %v887_v8  ;;  %v884_v10 = vpop.xlane.xlu0 %883 }
 0x157   :  { %v2196_v11 = vmul.f32 0.00390625, %v884_v10 }
 0x159   :  { %v893_v12 = vpop.xlane.xlu1 %892 }
 0x15a   :  { %v2198_v13 = vmul.f32 0.00390625, %v893_v12  ;;  %v890_v14 = vpop.xlane.xlu0 %889 }
 0x15b   :  { %v2200_v15 = vmul.f32 0.00390625, %v890_v14 }
 0x15d   :  { %v899_v16 = vpop.xlane.xlu1 %898 }
 0x15e   :  { %v2202_v17 = vmul.f32 0.00390625, %v899_v16  ;;  %v896_v18 = vpop.xlane.xlu0 %895 }
 0x15f   :  { %v2204_v19 = vmul.f32 0.00390625, %v896_v18 }
 0x161   :  { %v905_v20 = vpop.xlane.xlu1 %904 }
 0x162   :  { %v2206_v21 = vmul.f32 0.00390625, %v905_v20  ;;  %v902_v22 = vpop.xlane.xlu0 %901 }
 0x163   :  { %v2208_v23 = vmul.f32 0.00390625, %v902_v22 }
 0x165   :  { %v911_v24 = vpop.xlane.xlu1 %910 }
 0x166   :  { %v2210_v25 = vmul.f32 0.00390625, %v911_v24  ;;  %v908_v26 = vpop.xlane.xlu0 %907 }
 0x167   :  { %v2212_v27 = vmul.f32 0.00390625, %v908_v26 }
 0x169   :  { %v917_v28 = vpop.xlane.xlu1 %916 }
 0x16a   :  { %v2214_v29 = vmul.f32 0.00390625, %v917_v28  ;;  %v914_v30 = vpop.xlane.xlu0 %913 }
 0x16b   :  { %v2216_v31 = vmul.f32 0.00390625, %v914_v30 }
 0x16c   :  { %1999 = dma.done.wait [#allocation4], 16 }
 0x16d   :  { %2000 = vsyncadd [#allocation4], 4294967280 }
 0x16e   :  { %2001 = dma.done.wait [#allocation4 + $0x1], 16 }
 0x16f   :  { %2002 = vsyncadd [#allocation4 + $0x1], 4294967280 }
 0x170   :  { %2003 = dma.done.wait [#allocation4 + $0x2], 16 }
 0x171   :  { %2004 = vsyncadd [#allocation4 + $0x2], 4294967280 }
 0x172   :  { %2005 = dma.done.wait [#allocation4 + $0x3], 16 }
 0x173   :  { %2006 = vsyncadd [#allocation4 + $0x3], 4294967280 }
 0x174   :  { %2007 = dma.done.wait [#allocation4 + $0x4], 16 }
 0x175   :  { %2008 = vsyncadd [#allocation4 + $0x4], 4294967280 }
 0x176   :  { %2009 = dma.done.wait [#allocation4 + $0x5], 16 }
 0x177   :  { %2010 = vsyncadd [#allocation4 + $0x5], 4294967280 }
 0x178   :  { %2011 = dma.done.wait [#allocation4 + $0x6], 16 }
 0x179   :  { %2012 = vsyncadd [#allocation4 + $0x6], 4294967280 }
 0x17a   :  { %2013 = dma.done.wait [#allocation4 + $0x7], 16 }
 0x17b   :  { %2014 = vsyncadd [#allocation4 + $0x7], 4294967280 }
 0x17c   :  { %2015 = dma.done.wait [#allocation4 + $0x8], 16 }
 0x17d   :  { %2016 = vsyncadd [#allocation4 + $0x8], 4294967280 }
 0x17e   :  { %2017 = dma.done.wait [#allocation4 + $0x9], 16 }
 0x17f   :  { %2018 = vsyncadd [#allocation4 + $0x9], 4294967280 }
 0x180   :  { %2019 = dma.done.wait [#allocation4 + $0xa], 16 }
 0x181   :  { %2020 = vsyncadd [#allocation4 + $0xa], 4294967280 }
 0x182   :  { %2021 = dma.done.wait [#allocation4 + $0xb], 16 }
 0x183   :  { %2022 = vsyncadd [#allocation4 + $0xb], 4294967280 }
 0x184   :  { %2023 = dma.done.wait [#allocation4 + $0xc], 16 }
 0x185   :  { %2024 = vsyncadd [#allocation4 + $0xc], 4294967280 }
 0x186   :  { %2025 = dma.done.wait [#allocation4 + $0xd], 16 }
 0x187   :  { %2026 = vsyncadd [#allocation4 + $0xd], 4294967280 }
 0x188   :  { %2027 = dma.done.wait [#allocation4 + $0xe], 16 }
 0x189   :  { %2028 = vsyncadd [#allocation4 + $0xe], 4294967280 }
 0x18a   :  { %2029 = dma.done.wait [#allocation4 + $0xf], 16 }
 0x18b   :  { %2030 = vsyncadd [#allocation4 + $0xf], 4294967280  ;;  %v2040_v32 = vmov 0.0|0.0   ;;  %vm2041_vm0 = vmmov 0   ;;  %v2042_v33 = vmov 0.0   ;;  %v2043_v34 = vmov 0  }
 0x18c   :  { %1844 = vmatprep.subr.bf16.mxu0 %v2040_v32  ;;  %1771 = vmatprep.mubr.msk.f32.mxu0 %vm2041_vm0, %v2042_v33  ;;  %1052 = vst [vmem:[#allocation3] sm:$0xf] %v2042_v33  ;;  %v968_v35 = vld [vmem:[#allocation2] sm:$0xff]  ;;  %v969_v36 = vld [vmem:[#allocation2 + $0x8] sm:$0xff]  ;;  %vm970_vm1 = vcmask 130048   ;;  %v1177_v43 = vld [vmem:[%s2354_s5 + $0x10] sm:$0xff]  ;;  %v1069_v44 = vlaneseq }
 0x18d   :  { %1908 = vset.pattern.permute.xlu0 %v2043_v34  ;;  %1847 = vmatprep.subr.bf16.mxu1 %v2040_v32  ;;  %v1845_v37 = vpack.c.bf16 %v969_v36, %v968_v35  ;;  %v1044_v38 = vld [vmem:[%s2353_s4] sm:$0x3]  ;;  %v1176_v42 = vld [vmem:[%s2354_s5 + $0x8] sm:$0xff]  ;;  %v1178_v46 = vld [vmem:[%s2354_s5 + $0x18] sm:$0xff]  ;;  %vm1080_vm2 = vcmask 130112   ;;  %vm1087_vm3 = vcmask 195712  }
 0x18e   :  { %1806 = vmatprep.mubr.msk.f32.mxu1 %vm2041_vm0, %v2042_v33  ;;  %1909 = vrcp.f32 %v1044_v38  ;;  %v967_v39 = vld [vmem:[%s2352_s3] sm:$0x3]  ;;  %v1180_v48 = vld [vmem:[%s2354_s5 + $0x28] sm:$0xff]  ;;  %v1070_v49 = vand.u32 127, %v1069_v44  ;;  %v1072_v50 = vshrl.u32 %v1069_v44, 7  ;;  %v1851_v51 = vpack.c.bf16 %v1178_v46, %v1177_v43  ;;  %v1181_v59 = vld [vmem:[%s2354_s5 + $0x30] sm:$0xff] }
 0x18f   :  { %1846 = vmatpush3.bf16.msra.mxu0 %v1845_v37  ;;  %v1175_v41 = vld [vmem:[%s2354_s5] sm:$0xff]  ;;  %vm1094_vm4 = vcmask 261312   ;;  %vm1101_vm5 = vcmask 326912   ;;  %vm1108_vm6 = vcmask 392512   ;;  %vm1115_vm7 = vcmask 458112   ;;  %v1182_v60 = vld [vmem:[%s2354_s5 + $0x38] sm:$0xff] }
 0x190   :  { %1871 = vmatprep.subr.bf16.mxu0 %v2040_v32  ;;  %v1848_v45 = vpack.c.bf16 %v1176_v42, %v1175_v41  ;;  %v1179_v47 = vld [vmem:[%s2354_s5 + $0x20] sm:$0xff]  ;;  %v1073_v53 = vsub.s32 %v1070_v49, %v1072_v50  ;;  %v1075_v54 = vadd.s32 4294967288, %v1070_v49  ;;  %v1082_v55 = vadd.s32 4294967280, %v1070_v49  ;;  %v1188_v46 = vld [vmem:[%s2354_s5 + $0x68] sm:$0xff]  ;;  %s2044_s24 = smov 64  }
 0x191   :  { %v1854_v52 = vpack.c.bf16 %v1180_v48, %v1179_v47  ;;  %v1089_v56 = vadd.s32 4294967272, %v1070_v49  ;;  %v1096_v57 = vadd.s32 4294967264, %v1070_v49  ;;  %v1103_v58 = vadd.s32 4294967256, %v1070_v49  ;;  %v1189_v48 = vld [vmem:[%s2354_s5 + $0x70] sm:$0xff] }
 0x192   :  { %1772 = vmatmul.mubr.msk.f32.vlgmr.msra.gmra.mrb[0].mxu0 %vm970_vm1, %v967_v39  ;;  %1849 = vmatpush3.bf16.msra.mxu1 %v1848_v45  ;;  %v1074_v61 = vrot.slane %v2188_v3, %v1073_v53  ;;  %v1078_v62 = vsub.s32 %v1075_v54, %v1072_v50  ;;  %v1110_v63 = vadd.s32 4294967248, %v1070_v49  ;;  %v1117_v0 = vadd.s32 4294967240, %v1070_v49  ;;  %v1187_v45 = vld [vmem:[%s2354_s5 + $0x60] sm:$0xff]  ;;  %v1190_v49 = vld [vmem:[%s2354_s5 + $0x78] sm:$0xff] }
 0x193   :  { %1841 = vmatprep.mubr.msk.f32.mxu0 %vm2041_vm0, %v2042_v33  ;;  %1850 = vmatprep.subr.bf16.mxu1 %v2040_v32  ;;  %v1085_v2 = vsub.s32 %v1082_v55, %v1072_v50  ;;  %v1092_v4 = vsub.s32 %v1089_v56, %v1072_v50  ;;  %v1099_v6 = vsub.s32 %v1096_v57, %v1072_v50  ;;  %vm1122_vm8 = vcmask 523712  }
 0x194   :  { %v1106_v8 = vsub.s32 %v1103_v58, %v1072_v50  ;;  %v1079_v10 = vrot.slane %v2192_v7, %v1078_v62  ;;  %v1113_v12 = vsub.s32 %v1110_v63, %v1072_v50  ;;  %v1120_v14 = vsub.s32 %v1117_v0, %v1072_v50  ;;  %v1275_v63 = vld [vmem:[#allocation10 + $0x20] sm:$0xff]  ;;  %v1276_v0 = vld [vmem:[#allocation10 + $0x28] sm:$0xff] }
 0x195   :  { %v1127_v16 = vrot.slane %v2204_v19, %v1073_v53  ;;  %v1857_v18 = vpack.c.bf16 %v1182_v60, %v1181_v59  ;;  %v1086_v20 = vrot.slane %v2186_v1, %v1085_v2  ;;  %v1093_v3 = vrot.slane %v2190_v5, %v1092_v4  ;;  %v1183_v5 = vld [vmem:[%s2354_s5 + $0x40] sm:$0xff] }
 0x196   :  { %1852 = vmatpush3.bf16.msra.mxu1 %v1851_v51  ;;  %v1100_v22 = vrot.slane %v2196_v11, %v1099_v6  ;;  %v1081_v24 = vsel %vm1080_vm2, %v1079_v10, %v1074_v61  ;;  %v1107_v26 = vrot.slane %v2194_v9, %v1106_v8  ;;  %v1114_v28 = vrot.slane %v2200_v15, %v1113_v12  ;;  %v1184_v9 = vld [vmem:[%s2354_s5 + $0x48] sm:$0xff]  ;;  %v1272_v53 = vld [vmem:[#allocation10 + $0x8] sm:$0xff]  ;;  %v1279_v10 = vld [vmem:[#allocation10 + $0x40] sm:$0xff] }
 0x197   :  { %1853 = vmatprep.subr.bf16.mxu1 %v2040_v32  ;;  %v1131_v30 = vrot.slane %v2202_v17, %v1078_v62  ;;  %v1088_v7 = vsel %vm1087_vm3, %v1086_v20, %v1081_v24  ;;  %v1136_v19 = vrot.slane %v2208_v23, %v1085_v2  ;;  %v1141_v33 = vrot.slane %v2206_v21, %v1092_v4  ;;  %v1273_v60 = vld [vmem:[#allocation10 + $0x10] sm:$0xff]  ;;  %v1274_v61 = vld [vmem:[#allocation10 + $0x18] sm:$0xff] }
 0x198   :  { %v1910_v40 = vpop.eup %1909  ;;  %v1146_v1 = vrot.slane %v2212_v27, %v1099_v6  ;;  %v1095_v11 = vsel %vm1094_vm4, %v1093_v3, %v1088_v7  ;;  %v1121_v15 = vrot.slane %v2198_v13, %v1120_v14  ;;  %v1151_v21 = vrot.slane %v2210_v25, %v1106_v8  ;;  %v1185_v25 = vld [vmem:[%s2354_s5 + $0x50] sm:$0xff]  ;;  %v1277_v4 = vld [vmem:[#allocation10 + $0x30] sm:$0xff]  ;;  %v1191_v7 = vld [vmem:[%s2355_s6] sm:$0xf] }
 0x199   :  { %1048 = vperm.xlu0 %1908, %v1910_v40   ;;  %v1132_v17 = vsel %vm1080_vm2, %v1131_v30, %v1127_v16  ;;  %v1102_v23 = vsel %vm1101_vm5, %v1100_v22, %v1095_v11  ;;  %v1156_v34 = vrot.slane %v2216_v31, %v1113_v12  ;;  %v1161_v37 = vrot.slane %v2214_v29, %v1120_v14  ;;  %v1186_v31 = vld [vmem:[%s2354_s5 + $0x58] sm:$0xff]  ;;  %v1278_v6 = vld [vmem:[#allocation10 + $0x38] sm:$0xff]  ;;  %v1281_v16 = vld [vmem:[#allocation10 + $0x50] sm:$0xff] }
 0x19a   :  { %1855 = vmatpush3.bf16.msra.mxu1 %v1854_v52  ;;  %v1137_v27 = vsel %vm1087_vm3, %v1136_v19, %v1132_v17  ;;  %v1109_v35 = vsel %vm1108_vm6, %v1107_v26, %v1102_v23  ;;  %v1860_v38 = vpack.c.bf16 %v1184_v9, %v1183_v5  ;;  %vm1163_vm9 = vcmask 1041409   ;;  %v1271_v52 = vld [vmem:[#allocation10] sm:$0xff]  ;;  %v1280_v12 = vld [vmem:[#allocation10 + $0x48] sm:$0xff]  ;;  %v1285_v26 = vld [vmem:[#allocation10 + $0x70] sm:$0xff] }
 0x19b   :  { %1856 = vmatprep.subr.bf16.mxu1 %v2040_v32  ;;  %v1142_v36 = vsel %vm1094_vm4, %v1141_v33, %v1137_v27  ;;  %v1116_v13 = vsel %vm1115_vm7, %v1114_v28, %v1109_v35  ;;  %vm1166_vm10 = vcmask 517120   ;;  %v1863_v43 = vpack.c.bf16 %v1186_v31, %v1185_v25  ;;  %v1283_v3 = vld [vmem:[#allocation10 + $0x60] sm:$0xff]  ;;  %v1284_v22 = vld [vmem:[#allocation10 + $0x68] sm:$0xff]  ;;  %v1286_v28 = vld [vmem:[#allocation10 + $0x78] sm:$0xff] }
 0x19c   :  { %v1147_v39 = vsel %vm1101_vm5, %v1146_v1, %v1142_v36  ;;  %v1123_v40 = vsel %vm1122_vm8, %v1121_v15, %v1116_v13  ;;  %v1866_v47 = vpack.c.bf16 %v1188_v46, %v1187_v45  ;;  %v1869_v50 = vpack.c.bf16 %v1190_v49, %v1189_v48  ;;  %v1365_v31 = vld [vmem:[%s2360_s11] sm:$0xf]  ;;  %s2045_s11 = smov [#allocation12]  }
 0x19d   :  { %v1152_v29 = vsel %vm1108_vm6, %v1151_v21, %v1147_v39  ;;  %v1872_v54 = vpack.c.bf16 %v1272_v53, %v1271_v52  ;;  %vm1172_vm11 = vcmask 1041920   ;;  %v1875_v62 = vpack.c.bf16 %v1274_v61, %v1273_v60  ;;  %v1377_v49 = vld [vmem:[%s2359_s10] sm:$0xf]  ;;  %s1386_s27 = sshll.u32 %s2045_s11, 4  ;;  %s1387_s27 = int_to_ptr.vmem [resolvable:$true] %s1386_s27 }
 0x19e   :  { %1858 = vmatpush3.bf16.msra.mxu1 %v1857_v18  ;;  %v1157_v41 = vsel %vm1115_vm7, %v1156_v34, %v1152_v29  ;;  %v1878_v2 = vpack.c.bf16 %v1276_v0, %v1275_v63  ;;  %v1881_v8 = vpack.c.bf16 %v1278_v6, %v1277_v4  ;;  %v1884_v14 = vpack.c.bf16 %v1280_v12, %v1279_v10  ;;  %v1282_v18 = vld [vmem:[#allocation10 + $0x58] sm:$0xff]  ;;  %s1971_s13 = scalar_lea.vmem %s1387_s27, 64  ;;  %p1976_p8 = scmp.lt.s32.totalorder %s1387_s27, %s1387_s27 }
 0x19f   :  { %1859 = vmatprep.subr.bf16.mxu1 %v2040_v32  ;;  %v1162_v42 = vsel %vm1122_vm8, %v1161_v37, %v1157_v41  ;;  %1873 = vmatpush3.bf16.msra.mxu0 %v1872_v54  ;;  %v1887_v20 = vpack.c.bf16 %v1282_v18, %v1281_v16  ;;  %v1890_v24 = vpack.c.bf16 %v1284_v22, %v1283_v3  ;;  %vm1359_vm12 = vcmask 1043456   ;;  %p1972_p7 = scmp.ne.s32.totalorder %s1387_s27, %s1971_s13  ;;  %p1977_p9 = scmp.lt.s32.totalorder %s1971_s13, %s1971_s13 }
 0x1a0   :  { %v1164_v44 = vsel %vm1163_vm9, %v1162_v42, %v1123_v40  ;;  %1874 = vmatprep.subr.bf16.mxu0 %v2040_v32  ;;  %v1893_v30 = vpack.c.bf16 %v1286_v28, %v1285_v26 }
 0x1a1   :  { %1167 = vst.msk [vmem:[#allocation3] sm:$0x3] %vm1166_vm10, %v1164_v44  ;;  %p1978_p10 = por %p1977_p9, %p1976_p8 }
 0x1a2   :  { %1861 = vmatpush3.bf16.msra.mxu1 %v1860_v38 }
 0x1a3   :  { %1862 = vmatprep.subr.bf16.mxu1 %v2040_v32  ;;  %1876 = vmatpush3.bf16.msra.mxu0 %v1875_v62  ;;  %p1979_p11 = pnand %p1978_p10, %p1972_p7 }
 0x1a4   :  { %1877 = vmatprep.subr.bf16.mxu0 %v2040_v32 }
 0x1a6   :  { %1864 = vmatpush3.bf16.msra.mxu1 %v1863_v43 }
 0x1a7   :  { %1865 = vmatprep.subr.bf16.mxu1 %v2040_v32  ;;  %1879 = vmatpush3.bf16.msra.mxu0 %v1878_v2 }
 0x1a8   :  { %1880 = vmatprep.subr.bf16.mxu0 %v2040_v32 }
 0x1aa   :  { %1867 = vmatpush3.bf16.msra.mxu1 %v1866_v47  ;;  %v1375_v47 = vld [vmem:[%s2358_s9] sm:$0xf] }
 0x1ab   :  { %1868 = vmatprep.subr.bf16.mxu1 %v2040_v32  ;;  %1882 = vmatpush3.bf16.msra.mxu0 %v1881_v8 }
 0x1ac   :  { %1883 = vmatprep.subr.bf16.mxu0 %v2040_v32 }
 0x1ae   :  { %1870 = vmatpush3.bf16.msra.mxu1 %v1869_v50 }
 0x1af   :  { %1885 = vmatpush3.bf16.msra.mxu0 %v1884_v14 }
 0x1b0   :  { %1886 = vmatprep.subr.bf16.mxu0 %v2040_v32 }
 0x1b3   :  { %1888 = vmatpush3.bf16.msra.mxu0 %v1887_v20 }
 0x1b4   :  { %1889 = vmatprep.subr.bf16.mxu0 %v2040_v32 }
 0x1b7   :  { %1891 = vmatpush3.bf16.msra.mxu0 %v1890_v24 }
 0x1b8   :  { %1892 = vmatprep.subr.bf16.mxu0 %v2040_v32  ;;  %v1287_v32 = vld [vmem:[%s2357_s8] sm:$0xf] }
 0x1bb   :  { %1894 = vmatpush3.bf16.msra.mxu0 %v1893_v30 }
 0x218   :  { %v1049_v51 = vpop.permute.xlu0 %1048 }
 0x265   :  { %v1040_v55 = vpop.f32.mrb[0].mxu0 }
 0x266   :  { %v1051_v56 = vmul.f32 %v1049_v51, %v1040_v55  ;;  %v1773_v57 = vpop.f32.mrb[1].mxu0 }
 0x268   :  { %1169 = vrot.lane.b32.xlu0 %v1051_v56, %s2044_s24 }
 0x2da   :  { %v1170_v58 = vpop.permute.xlu0 %1169 }
 0x2db   :  { %1173 = vst.msk [vmem:[#allocation3 + $0x2] sm:$0x3] %vm1172_vm11, %v1170_v58 }
 0x2e2   :  { %v1174_v59 = vld [vmem:[#allocation3] sm:$0xf] }
 0x2e3   :  { %1807 = vmatmul.mubr.f32.vlgmr.msra.gmra.mrb[0].mxu1 %v1174_v59 }
 0x3b6   :  { %v1258_v19 = vpop.f32.mrb[0].mxu1 }
 0x3b7   :  { %v1259_v33 = vadd.f32 %v1258_v19, %v1191_v7  ;;  %v1808_v1 = vpop.f32.mrb[1].mxu1 }
 0x3b9   :  { %v1263_v5 = vmul.f32 0.044715, %v1259_v33  ;;  %v1262_v23 = vmul.f32 0.5, %v1259_v33 }
 0x3bb   :  { %v1264_v9 = vmul.f32 %v1263_v5, %v1259_v33 }
 0x3bd   :  { %v1265_v11 = vmul.f32 %v1264_v9, %v1259_v33 }
 0x3bf   :  { %v1266_v15 = vadd.f32 %v1265_v11, %v1259_v33 }
 0x3c1   :  { %v1267_v17 = vmul.f32 0.7978846, %v1266_v15 }
 0x3c3   :  { %1911 = vtanh.f32 %v1267_v17 }
 0x3cd   :  { %v1912_v21 = vpop.eup %1911 }
 0x3ce   :  { %v1269_v27 = vadd.f32 1.0, %v1912_v21 }
 0x3d0   :  { %v1270_v34 = vmul.f32 %v1269_v27, %v1262_v23 }
 0x3d2   :  { %1842 = vmatmul.mubr.f32.vlgmr.msra.gmra.mrb[2].mxu0 %v1270_v34 }
 0x4a5   :  { %v1354_v35 = vpop.f32.mrb[2].mxu0 }
 0x4a6   :  { %v1355_v36 = vadd.f32 %v1354_v35, %v1287_v32  ;;  %v1843_v37 = vpop.f32.mrb[3].mxu0 }
 0x4a8   :  { %v1358_v38 = vadd.f32 %v1355_v36, %v1259_v33 }
 0x4aa   :  { %v1360_v13 = vsel %vm1359_vm12, %v1358_v38, 0.0 }
 0x4ab   :  { %1361 = vadd.xlane.f32.xlu1 %v1360_v13 }
 0x538   :  { %v1362_v39 = vpop.xlane.xlu1 %1361 }
 0x539   :  { %v1363_v25 = vmul.f32 0.03125, %v1362_v39 }
 0x53b   :  { %v1364_v40 = vsub.f32 %v1358_v38, %v1363_v25 }
 0x53d   :  { %v1366_v29 = vmul.f32 %v1365_v31, %v1364_v40 }
 0x53f   :  { %v1367_v41 = vmul.f32 %v1366_v29, %v1366_v29 }
 0x541   :  { %v1368_v42 = vsel %vm1359_vm12, %v1367_v41, 0.0 }
 0x542   :  { %1369 = vadd.xlane.f32.xlu1 %v1368_v42 }
 0x5cf   :  { %v1370_v43 = vpop.xlane.xlu1 %1369 }
 0x5d0   :  { %v1371_v44 = vmul.f32 0.03125, %v1370_v43 }
 0x5d2   :  { %v1372_v45 = vadd.f32 1e-05, %v1371_v44 }
 0x5d4   :  { %1913 = vrsqrt.f32 %v1372_v45 }
 0x5de   :  { %v1914_v46 = vpop.eup %1913 }
 0x5df   :  { %v1374_v48 = vmul.f32 %v1914_v46, %v1366_v29 }
 0x5e1   :  { %v1376_v50 = vmul.f32 %v1375_v47, %v1374_v48 }
 0x5e3   :  { %v1378_v51 = vadd.f32 %v1377_v49, %v1376_v50 }
 0x5e5   :  { %1379 = vst [vmem:[#allocation12] sm:$0xf] %v1378_v51 }
 0x5e6   :  { %1982 = shalt.err (!%p1979_p11)
}
 0x5e7   :  { %s1983_s15 = scalar_lea.hbm %s2361_s12, 64 }
 0x5e8   :  { %p1984_p12 = scmp.ne.s32.totalorder %s2361_s12, %s1983_s15  ;;  %p1987_p13 = scmp.lt.u32.totalorder %s1983_s15, %s2361_s12 }
 0x5ea   :  { %p1989_p0 = pnand %p1987_p13, %p1984_p12 }
 0x5ec   :  { %1992 = shalt.err (!%p1989_p0)
}
 0x5ed   :  { %1389 = dma.vmem_to_hbm [thread:$0]  %s1387_s27, 64, %s2361_s12, [#allocation9]  }
 0x5ee   :  { %2031 = dma.done.wait [#allocation9], 64  }
 0x5ef   :  { %2032 = vsyncadd [#allocation9], 4294967232 }
 0x5f0   :  { %1393 = vsyncpa [#allocation8], 1 }
 0x5f1   :  { %1394 = vsyncpa [#allocation11], 1 }
 0x5f2   :  { %1395 = vsyncpa [#allocation9], 1 }
 0x5f3   :  { %1396 = vsyncmov [#allocation4] }
 0x5f6   :  { %s1397_s20 = vpop.sfrf %1396 }
 0x5f7   :  { %p1714_p1 = scmp.ne.s32.totalorder %s1397_s20, 0 }
 0x5f9   :  { %1401 = shalt.err (%p1714_p1)  }
 0x5fa   :  { %1403 = vsyncmov [#allocation4 + $0x1] }
 0x5fd   :  { %s1404_s21 = vpop.sfrf %1403 }
 0x5fe   :  { %p1715_p2 = scmp.ne.s32.totalorder %s1404_s21, 0 }
 0x600   :  { %1408 = shalt.err (%p1715_p2)  }
 0x601   :  { %1410 = vsyncmov [#allocation4 + $0x2] }
 0x604   :  { %s1411_s4 = vpop.sfrf %1410 }
 0x605   :  { %p1716_p3 = scmp.ne.s32.totalorder %s1411_s4, 0 }
 0x607   :  { %1415 = shalt.err (%p1716_p3)  }
 0x608   :  { %1417 = vsyncmov [#allocation4 + $0x3] }
 0x60b   :  { %s1418_s23 = vpop.sfrf %1417 }
 0x60c   :  { %p1717_p4 = scmp.ne.s32.totalorder %s1418_s23, 0 }
 0x60e   :  { %1422 = shalt.err (%p1717_p4)  }
 0x60f   :  { %1424 = vsyncmov [#allocation4 + $0x4] }
 0x612   :  { %s1425_s12 = vpop.sfrf %1424 }
 0x613   :  { %p1718_p5 = scmp.ne.s32.totalorder %s1425_s12, 0 }
 0x615   :  { %1429 = shalt.err (%p1718_p5)  }
 0x616   :  { %1431 = vsyncmov [#allocation4 + $0x5] }
 0x619   :  { %s1432_s7 = vpop.sfrf %1431 }
 0x61a   :  { %p1719_p6 = scmp.ne.s32.totalorder %s1432_s7, 0 }
 0x61c   :  { %1436 = shalt.err (%p1719_p6)  }
 0x61d   :  { %1438 = vsyncmov [#allocation4 + $0x6] }
 0x620   :  { %s1439_s3 = vpop.sfrf %1438 }
 0x621   :  { %p1720_p7 = scmp.ne.s32.totalorder %s1439_s3, 0 }
 0x623   :  { %1443 = shalt.err (%p1720_p7)  }
 0x624   :  { %1445 = vsyncmov [#allocation4 + $0x7] }
 0x627   :  { %s1446_s22 = vpop.sfrf %1445 }
 0x628   :  { %p1721_p8 = scmp.ne.s32.totalorder %s1446_s22, 0 }
 0x62a   :  { %1450 = shalt.err (%p1721_p8)  }
 0x62b   :  { %1452 = vsyncmov [#allocation4 + $0x8] }
 0x62e   :  { %s1453_s24 = vpop.sfrf %1452 }
 0x62f   :  { %p1722_p9 = scmp.ne.s32.totalorder %s1453_s24, 0 }
 0x631   :  { %1457 = shalt.err (%p1722_p9)  }
 0x632   :  { %1459 = vsyncmov [#allocation4 + $0x9] }
 0x635   :  { %s1460_s5 = vpop.sfrf %1459 }
 0x636   :  { %p1723_p10 = scmp.ne.s32.totalorder %s1460_s5, 0 }
 0x638   :  { %1464 = shalt.err (%p1723_p10)  }
 0x639   :  { %1466 = vsyncmov [#allocation4 + $0xa] }
 0x63c   :  { %s1467_s25 = vpop.sfrf %1466 }
 0x63d   :  { %p1724_p11 = scmp.ne.s32.totalorder %s1467_s25, 0 }
 0x63f   :  { %1471 = shalt.err (%p1724_p11)  }
 0x640   :  { %1473 = vsyncmov [#allocation4 + $0xb] }
 0x643   :  { %s1474_s26 = vpop.sfrf %1473 }
 0x644   :  { %p1725_p12 = scmp.ne.s32.totalorder %s1474_s26, 0 }
 0x646   :  { %1478 = shalt.err (%p1725_p12)  }
 0x647   :  { %1480 = vsyncmov [#allocation4 + $0xc] }
 0x64a   :  { %s1481_s0 = vpop.sfrf %1480 }
 0x64b   :  { %p1726_p13 = scmp.ne.s32.totalorder %s1481_s0, 0 }
 0x64d   :  { %1485 = shalt.err (%p1726_p13)  }
 0x64e   :  { %1487 = vsyncmov [#allocation4 + $0xd] }
 0x651   :  { %s1488_s6 = vpop.sfrf %1487 }
 0x652   :  { %p1727_p0 = scmp.ne.s32.totalorder %s1488_s6, 0 }
 0x654   :  { %1492 = shalt.err (%p1727_p0)  }
 0x655   :  { %1494 = vsyncmov [#allocation4 + $0xe] }
 0x658   :  { %s1495_s28 = vpop.sfrf %1494 }
 0x659   :  { %p1728_p1 = scmp.ne.s32.totalorder %s1495_s28, 0 }
 0x65b   :  { %1499 = shalt.err (%p1728_p1)  }
 0x65c   :  { %1501 = vsyncmov [#allocation4 + $0xf] }
 0x65f   :  { %s1502_s8 = vpop.sfrf %1501 }
 0x660   :  { %p1729_p2 = scmp.ne.s32.totalorder %s1502_s8, 0 }
 0x662   :  { %1506 = shalt.err (%p1729_p2)  }

</bundles_post_ra>
